<compile_context>
chip_gen: v6e
topology: v6e:2x2x1
jax: 0.10.0
libtpu: 0.0.40
codegen_flags: <defaults>
</compile_context>

<pallas_src>
import functools

import jax
import jax.numpy as jnp
from jax import lax
from jax.experimental import pallas as pl
from jax.experimental.pallas import tpu as pltpu
import numpy as np


# ----------------------------------------------------------------------------
# Pallas kernel: 1x1 conv -> BN -> ReLU -> 3x3 dilated conv -> BN -> ReLU
#                -> 1x1 conv -> BN -> residual add -> ReLU  (one H-tile of one image)
# ----------------------------------------------------------------------------
def _bottleneck_kernel(d, TH, HB, has_halo, *refs):
    if has_halo:
        (xc_ref, xt_ref, xb_ref,
         w1_ref, s1_ref, b1_ref, w2_ref, s2_ref, b2_ref,
         w3_ref, s3_ref, b3_ref, out_ref, pad_ref) = refs
    else:
        (xc_ref,
         w1_ref, s1_ref, b1_ref, w2_ref, s2_ref, b2_ref,
         w3_ref, s3_ref, b3_ref, out_ref, pad_ref) = refs
        xt_ref = xb_ref = None

    h_idx = pl.program_id(1)
    _, _, W, Cin = xc_ref.shape
    Cmid = w1_ref.shape[1]

    w1 = w1_ref[...]        # (Cin, Cmid)  bf16
    s1 = s1_ref[...]        # (1, Cmid)    f32
    b1 = b1_ref[...]        # (1, Cmid)    f32

    def cbnr1(x_blk, rows):
        """1x1 conv (bf16 MXU, f32 acc) + folded BN + ReLU; result in bf16
        (the bf16 cast happens here so the padded scratch stays bf16)."""
        x2d = x_blk.reshape(rows * W, Cin).astype(jnp.bfloat16)
        h = jnp.dot(x2d, w1, preferred_element_type=jnp.float32)
        h = jnp.maximum(h * s1 + b1, 0.0)
        return h.reshape(rows, W, Cmid).astype(jnp.bfloat16)

    xc = xc_ref[...]                                   # (1, TH, W, Cin) f32
    h1_c = cbnr1(xc, TH)                               # (TH, W, Cmid)   bf16

    # Assemble the W-zero-padded bf16 buffer with halo rows along H.  Only the two
    # d-wide column strips need explicit zeroing; every row of the central W columns
    # is overwritten below on every grid step, so no stale data survives (the strips
    # are re-zeroed each step because grid axes may be split across TensorCores).
    Hp = TH + 2 * d
    zcol = jnp.zeros((Hp, d, Cmid), pad_ref.dtype)
    pad_ref[:, 0:d, :] = zcol
    pad_ref[:, d + W:, :] = zcol
    pad_ref[d:d + TH, d:d + W, :] = h1_c

    zrow = jnp.zeros((d, W, Cmid), pad_ref.dtype)
    if has_halo:
        # Halo rows from neighbouring H-tiles.  At the image border the BlockSpec
        # index_map clamps to a valid block; pl.when skips the (wasted) conv there
        # and writes the 3x3 conv's zero padding instead (also avoids 0*NaN leaks).
        @pl.when(h_idx > 0)
        def _():
            pad_ref[0:d, d:d + W, :] = cbnr1(xt_ref[...], d)

        @pl.when(h_idx == 0)
        def _():
            pad_ref[0:d, d:d + W, :] = zrow

        @pl.when(h_idx < HB - 1)
        def _():
            pad_ref[d + TH:, d:d + W, :] = cbnr1(xb_ref[...], d)

        @pl.when(h_idx == HB - 1)
        def _():
            pad_ref[d + TH:, d:d + W, :] = zrow
    else:
        # Single H-tile: the halo rows are pure zero padding (no halo DMA, no conv).
        pad_ref[0:d, d:d + W, :] = zrow
        pad_ref[d + TH:, d:d + W, :] = zrow

    # 3x3 dilated conv: 3 W(sublane)-shifted bf16 window loads (one per kx tap;
    # kx=0 is aligned), 3 cheap major-dim H slices per shift, 9 bf16 MXU matmuls
    # accumulated in f32 (acc seeded by the first tap — no zero-init + add).
    w2 = w2_ref[...]        # (9, Cmid, Cmid) bf16, tap index = ky*3 + kx
    acc = None
    for kx in range(3):
        sx = pad_ref[:, kx * d:kx * d + W, :]                        # (Hp, W, Cmid) bf16
        for ky in range(3):
            win = sx[ky * d:ky * d + TH]                             # (TH, W, Cmid)
            p = jnp.dot(win.reshape(TH * W, Cmid), w2[ky * 3 + kx],
                        preferred_element_type=jnp.float32)
            acc = p if acc is None else acc + p
    h2 = jnp.maximum(acc * s2_ref[...] + b2_ref[...], 0.0)

    # cbn_3: 1x1 conv + folded BN (no ReLU), then residual add + ReLU.
    h3 = jnp.dot(h2.astype(jnp.bfloat16), w3_ref[...],
                 preferred_element_type=jnp.float32)
    h3 = h3 * s3_ref[...] + b3_ref[...]

    res = xc.reshape(TH * W, Cin)
    out_ref[...] = jnp.maximum(h3 + res, 0.0).reshape(1, TH, W, Cin).astype(out_ref.dtype)


def _const_spec(shape):
    """Grid-invariant operand: constant block index so it stays VMEM-resident and is
    not re-streamed per tile.  (On v7x, pipeline_mode=pl.Buffered(1) would halve the
    weight footprint; kept off here for lowering portability.)"""
    nd = len(shape)
    return pl.BlockSpec(shape, lambda n, h, _nd=nd: (0,) * _nd)


# ----------------------------------------------------------------------------
# VMEM sizing: weights (double-buffered), pipelined activation blocks, bf16 scratch
# and live intermediates are all accounted for; the weight footprint is subtracted
# from the budget before sizing TH.
# ----------------------------------------------------------------------------
def _weight_vmem_bytes(Cin, Cmid):
    w = (Cin * Cmid + 9 * Cmid * Cmid + Cmid * Cin) * 2      # bf16 conv weights
    sb = (4 * Cmid + 2 * Cin) * 4                            # f32 folded scale/bias
    return 2 * (w + sb)                                      # assume double-buffered


def _tile_vmem_bytes(TH, W, Cin, Cmid, d, has_halo):
    Hp, Wp = TH + 2 * d, W + 2 * d
    pad = Hp * Wp * Cmid * 2                                 # bf16 scratch (single copy)
    io = 2 * TH * W * Cin * 4 * 2                            # x centre + out, double-buffered
    if has_halo:
        io += 2 * 2 * d * W * Cin * 4                        # two halo input blocks
    act = (TH * W * Cmid * (4 + 2)                           # h1 f32 + bf16 copy
           + 2 * Hp * W * Cmid * 2                           # shifted bf16 window copies
           + 2 * TH * W * Cmid * 4                           # acc + h2 (f32)
           + 2 * TH * W * Cin * 4)                           # h3 + residual/output value
    return pad + io + act


def _pick_tile_h(N, H, W, Cin, Cmid, d, vmem_budget_bytes=40 << 20):
    """Largest halo-compatible H-tile dividing H that fits the VMEM budget.
    If N == 1, prefer HB >= 2 so both v7x TensorCores get grid work."""
    budget = vmem_budget_bytes - _weight_vmem_bytes(Cin, Cmid)
    cands = [th for th in range(1, H + 1)
             if H % th == 0 and (th == H or th % d == 0)]
    min_hb = 2 if N < 2 else 1
    for want_hb in (min_hb, 1):
        fits = [th for th in cands
                if H // th >= want_hb
                and _tile_vmem_bytes(th, W, Cin, Cmid, d, H // th > 1) <= budget]
        if fits:
            return max(fits)
    return min(cands)


# ----------------------------------------------------------------------------
# Wrappers.
# ----------------------------------------------------------------------------
def bottleneck_identify_psp_nhwc(x, params, dilation, *, tile_h=None,
                                 out_dtype=jnp.float32):
    """Fused PSP bottleneck identity block on NHWC input (channels on lanes)."""
    N, H, W, Cin = x.shape
    w1, s1, b1, w2, s2, b2, w3, s3, b3 = params
    Cmid = w1.shape[1]
    d = int(dilation)

    if tile_h is None:
        tile_h = _pick_tile_h(N, H, W, Cin, Cmid, d)
    TH = int(tile_h)
    assert H % TH == 0, "tile_h must divide H"
    HB = H // TH
    assert HB == 1 or TH % d == 0, "tile_h must be a multiple of dilation when tiling H"
    has_halo = HB > 1

    # bf16 MXU operands (f32 accumulation in-kernel); folded BN stays f32.
    w1b = w1.astype(jnp.bfloat16)
    w2b = w2.astype(jnp.bfloat16)
    w3b = w3.astype(jnp.bfloat16)

    x_center = pl.BlockSpec((1, TH, W, Cin), lambda n, h: (n, h, 0, 0))
    const_operands = (w1b, s1, b1, w2b, s2, b2, w3b, s3, b3)
    const_specs = [_const_spec(a.shape) for a in const_operands]

    if has_halo:
        k = TH // d
        nblk = H // d
        x_top = pl.BlockSpec(
            (1, d, W, Cin), lambda n, h: (n, jnp.maximum(h * k - 1, 0), 0, 0))
        x_bot = pl.BlockSpec(
            (1, d, W, Cin), lambda n, h: (n, jnp.minimum((h + 1) * k, nblk - 1), 0, 0))
        operands = (x, x, x) + const_operands
        in_specs = [x_center, x_top, x_bot] + const_specs
    else:
        operands = (x,) + const_operands
        in_specs = [x_center] + const_specs

    # Raise the scoped-VMEM limit only when the estimate actually needs it (the
    # defaults are 16 MiB on v5e / 32 MiB on v6e,v7x); cap well below v7x's 64 MiB.
    est = _weight_vmem_bytes(Cin, Cmid) + _tile_vmem_bytes(TH, W, Cin, Cmid, d, has_halo)
    vmem_limit = None
    if est > (12 << 20):
        vmem_limit = int(min(est * 1.25 + (4 << 20), 56 << 20))

    kernel = functools.partial(_bottleneck_kernel, d, TH, HB, has_halo)

    return pl.pallas_call(
        kernel,
        out_shape=jax.ShapeDtypeStruct((N, H, W, Cin), out_dtype),
        grid=(N, HB),
        in_specs=in_specs,
        out_specs=pl.BlockSpec((1, TH, W, Cin), lambda n, h: (n, h, 0, 0)),
        scratch_shapes=[pltpu.VMEM((TH + 2 * d, W + 2 * d, Cmid), jnp.bfloat16)],
        compiler_params=pltpu.CompilerParams(
            dimension_semantics=("parallel", "parallel"),
            vmem_limit_bytes=vmem_limit),
    )(*operands)


def bottleneck_identify_psp(x_nchw, params, dilation, *, tile_h=None,
                            out_dtype=jnp.float32):
    """NCHW wrapper matching the PyTorch module layout.
    TODO(synk): for stacked bottleneck blocks keep activations NHWC end-to-end and
    call bottleneck_identify_psp_nhwc directly; these transposes are full HBM
    round-trips paid twice per block."""
    x = jnp.transpose(x_nchw, (0, 2, 3, 1))                  # -> NHWC (channels on lanes)
    out = bottleneck_identify_psp_nhwc(x, params, dilation, tile_h=tile_h,
                                       out_dtype=out_dtype)
    return jnp.transpose(out, (0, 3, 1, 2))                  # back to NCHW


# ----------------------------------------------------------------------------
# Pure-JAX reference (lax convs) mirroring the kernel's mixed precision:
# bf16 conv operands, f32 accumulation, f32 BN / ReLU / residual.
# ----------------------------------------------------------------------------
def _reference(x_nchw, raw, dilation):
    (w1_hwio, w2_hwio, w3_hwio,
     g1, be1, m1, v1, g2, be2, m2, v2, g3, be3, m3, v3) = raw
    eps = 1e-5
    dn = ("NHWC", "HWIO", "NHWC")
    x = jnp.transpose(x_nchw, (0, 2, 3, 1))

    def bn(h, g, be, m, v):
        return g * (h - m) / jnp.sqrt(v + eps) + be

    def conv(h, w, padding, dil):
        return lax.conv_general_dilated(
            h.astype(jnp.bfloat16), w.astype(jnp.bfloat16), (1, 1), padding,
            rhs_dilation=dil, dimension_numbers=dn,
            preferred_element_type=jnp.float32)

    h = jnp.maximum(bn(conv(x, w1_hwio, "VALID", (1, 1)), g1, be1, m1, v1), 0.0)
    h = jnp.maximum(bn(conv(h, w2_hwio, [(dilation, dilation)] * 2,
                            (dilation, dilation)), g2, be2, m2, v2), 0.0)
    h = bn(conv(h, w3_hwio, "VALID", (1, 1)), g3, be3, m3, v3)
    out = jnp.maximum(h + x, 0.0)
    return jnp.transpose(out, (0, 3, 1, 2))


# ----------------------------------------------------------------------------
# Deterministic parameter init (shapes from the module __init__).
# ----------------------------------------------------------------------------
def init_params(key, in_channels, mid_channels):
    ks = jax.random.split(key, 16)
    eps = 1e-5

    def bn_params(k, c):
        k1, k2, k3, k4 = jax.random.split(k, 4)
        gamma = 1.0 + 0.1 * jax.random.normal(k1, (c,), jnp.float32)
        beta = 0.1 * jax.random.normal(k2, (c,), jnp.float32)
        mean = 0.1 * jax.random.normal(k3, (c,), jnp.float32)
        var = 0.5 + jnp.abs(jax.random.normal(k4, (c,), jnp.float32)) * 0.5
        return gamma, beta, mean, var

    # Conv weights directly in HWIO (a fixed transpose of PyTorch's OIHW).
    w1_hwio = 0.3 * jax.random.normal(ks[0], (1, 1, in_channels, mid_channels), jnp.float32)
    w2_hwio = 0.3 * jax.random.normal(ks[1], (3, 3, mid_channels, mid_channels), jnp.float32)
    w3_hwio = 0.3 * jax.random.normal(ks[2], (1, 1, mid_channels, in_channels), jnp.float32)

    g1, be1, m1, v1 = bn_params(ks[3], mid_channels)
    g2, be2, m2, v2 = bn_params(ks[4], mid_channels)
    g3, be3, m3, v3 = bn_params(ks[5], in_channels)

    def fold(g, be, m, v):
        scale = g / jnp.sqrt(v + eps)
        bias = be - m * scale
        return scale.reshape(1, -1), bias.reshape(1, -1)

    s1, b1 = fold(g1, be1, m1, v1)
    s2, b2 = fold(g2, be2, m2, v2)
    s3, b3 = fold(g3, be3, m3, v3)

    kernel_params = (
        w1_hwio.reshape(in_channels, mid_channels),      # (Cin, Cmid)
        s1, b1,
        w2_hwio.reshape(9, mid_channels, mid_channels),  # (9, Cmid, Cmid), tap = ky*3+kx
        s2, b2,
        w3_hwio.reshape(mid_channels, in_channels),      # (Cmid, Cin)
        s3, b3,
    )
    raw = (w1_hwio, w2_hwio, w3_hwio,
           g1, be1, m1, v1, g2, be2, m2, v2, g3, be3, m3, v3)
    return kernel_params, raw


if __name__ == "__main__":
    N, Cin, H, W = 2, 8, 16, 16
    Cmid = 4

    key = jax.random.PRNGKey(0)
    kx_, kp = jax.random.split(key)
    x = jax.random.normal(kx_, (N, Cin, H, W), jnp.float32)

    kernel_params, raw_params = init_params(kp, Cin, Cmid)

    # Config 1: dilation=2, H tiled into 2 blocks of 8 rows -> grid (2, 2).
    # Exercises the cross-tile halo path (pl.when border handling on both sides).
    out = jax.block_until_ready(
        bottleneck_identify_psp(x, kernel_params, dilation=2, tile_h=8))
    ref = jax.block_until_ready(_reference(x, raw_params, dilation=2))
    np.testing.assert_allclose(np.asarray(out), np.asarray(ref), rtol=2e-3, atol=2e-3)
    assert out.shape == (N, Cin, H, W)

    # Config 2: dilation=4, auto tile selection -> single H tile, no-halo kernel
    # variant (no halo DMAs / wasted conv1 work) -> grid (2, 1).
    out2 = jax.block_until_ready(
        bottleneck_identify_psp(x, kernel_params, dilation=4, tile_h=None))
    ref2 = jax.block_until_ready(_reference(x, raw_params, dilation=4))
    np.testing.assert_allclose(np.asarray(out2), np.asarray(ref2), rtol=2e-3, atol=2e-3)

    print("KERNEL_OK")
</pallas_src>

<mosaic_0001>
module attributes {stable_mosaic.version = 11 : i64} {
  func.func @_bottleneck_kernel(%arg0: i32, %arg1: i32, %arg2: memref<1x8x16x8xf32, #tpu.memory_space<vmem>>, %arg3: memref<1x2x16x8xf32, #tpu.memory_space<vmem>>, %arg4: memref<1x2x16x8xf32, #tpu.memory_space<vmem>>, %arg5: memref<8x4xbf16, #tpu.memory_space<vmem>>, %arg6: memref<1x4xf32, #tpu.memory_space<vmem>>, %arg7: memref<1x4xf32, #tpu.memory_space<vmem>>, %arg8: memref<9x4x4xbf16, #tpu.memory_space<vmem>>, %arg9: memref<1x4xf32, #tpu.memory_space<vmem>>, %arg10: memref<1x4xf32, #tpu.memory_space<vmem>>, %arg11: memref<4x8xbf16, #tpu.memory_space<vmem>>, %arg12: memref<1x8xf32, #tpu.memory_space<vmem>>, %arg13: memref<1x8xf32, #tpu.memory_space<vmem>>, %arg14: memref<1x8x16x8xf32, #tpu.memory_space<vmem>>, %arg15: memref<12x20x4xbf16, #tpu.memory_space<vmem>>) attributes {dimension_semantics = [#tpu.dimension_semantics<parallel>, #tpu.dimension_semantics<parallel>], iteration_bounds = array<i64: 2, 2>, scalar_prefetch = 0 : i64, scratch_operands = 1 : i64, tpu.core_type = #tpu.core_type<tc>, window_params = [{transform_indices = @transform_0, window_bounds = array<i64: 1, 8, 16, 8>}, {transform_indices = @transform_1, window_bounds = array<i64: 1, 2, 16, 8>}, {transform_indices = @transform_2, window_bounds = array<i64: 1, 2, 16, 8>}, {pipeline_mode = #tpu.pipeline_mode<synchronous>, transform_indices = @transform_3, window_bounds = array<i64: 8, 4>}, {pipeline_mode = #tpu.pipeline_mode<synchronous>, transform_indices = @transform_4, window_bounds = array<i64: 1, 4>}, {pipeline_mode = #tpu.pipeline_mode<synchronous>, transform_indices = @transform_5, window_bounds = array<i64: 1, 4>}, {pipeline_mode = #tpu.pipeline_mode<synchronous>, transform_indices = @transform_6, window_bounds = array<i64: 9, 4, 4>}, {pipeline_mode = #tpu.pipeline_mode<synchronous>, transform_indices = @transform_7, window_bounds = array<i64: 1, 4>}, {pipeline_mode = #tpu.pipeline_mode<synchronous>, transform_indices = @transform_8, window_bounds = array<i64: 1, 4>}, {pipeline_mode = #tpu.pipeline_mode<synchronous>, transform_indices = @transform_9, window_bounds = array<i64: 4, 8>}, {pipeline_mode = #tpu.pipeline_mode<synchronous>, transform_indices = @transform_10, window_bounds = array<i64: 1, 8>}, {pipeline_mode = #tpu.pipeline_mode<synchronous>, transform_indices = @transform_11, window_bounds = array<i64: 1, 8>}, {transform_indices = @transform_12, window_bounds = array<i64: 1, 8, 16, 8>}]} {
    %c0 = arith.constant 0 : index
    %c0_0 = arith.constant 0 : index
    %0 = vector.load %arg5[%c0, %c0_0] : memref<8x4xbf16, #tpu.memory_space<vmem>>, vector<8x4xbf16>
    %c0_1 = arith.constant 0 : index
    %c0_2 = arith.constant 0 : index
    %1 = vector.load %arg6[%c0_1, %c0_2] : memref<1x4xf32, #tpu.memory_space<vmem>>, vector<1x4xf32>
    %c0_3 = arith.constant 0 : index
    %c0_4 = arith.constant 0 : index
    %2 = vector.load %arg7[%c0_3, %c0_4] : memref<1x4xf32, #tpu.memory_space<vmem>>, vector<1x4xf32>
    %c0_5 = arith.constant 0 : index
    %c0_6 = arith.constant 0 : index
    %c0_7 = arith.constant 0 : index
    %c0_8 = arith.constant 0 : index
    %3 = vector.load %arg2[%c0_5, %c0_6, %c0_7, %c0_8] : memref<1x8x16x8xf32, #tpu.memory_space<vmem>>, vector<1x8x16x8xf32>
    %4 = vector.shape_cast %3 : vector<1x8x16x8xf32> to vector<128x8xf32>
    %5 = arith.truncf %4 : vector<128x8xf32> to vector<128x8xbf16>
    %cst = arith.constant dense<0.000000e+00> : vector<128x4xf32>
    %6 = tpu.matmul %5, %0, %cst {dimension_numbers = #tpu.dot_dimension_numbers<[1], [0], [0], [1], [0, 0, 1, 1], [], []>} : vector<128x8xbf16>, vector<8x4xbf16>, vector<128x4xf32> -> vector<128x4xf32>
    %7 = vector.broadcast %1 : vector<1x4xf32> to vector<128x4xf32>
    %8 = arith.mulf %6, %7 : vector<128x4xf32>
    %9 = vector.broadcast %2 : vector<1x4xf32> to vector<128x4xf32>
    %10 = arith.addf %8, %9 : vector<128x4xf32>
    %cst_9 = arith.constant 0.000000e+00 : f32
    %11 = vector.broadcast %cst_9 : f32 to vector<128x4xf32>
    %12 = arith.maximumf %10, %11 : vector<128x4xf32>
    %13 = vector.shape_cast %12 : vector<128x4xf32> to vector<8x16x4xf32>
    %14 = arith.truncf %13 : vector<8x16x4xf32> to vector<8x16x4xbf16>
    %cst_10 = arith.constant 0.000000e+00 : bf16
    %15 = vector.broadcast %cst_10 : bf16 to vector<12x2x4xbf16>
    %c0_11 = arith.constant 0 : index
    %c0_12 = arith.constant 0 : index
    %c0_13 = arith.constant 0 : index
    %16 = vector.load %arg15[%c0_11, %c0_12, %c0_13] : memref<12x20x4xbf16, #tpu.memory_space<vmem>>, vector<12x2x4xbf16>
    tpu.vector_store %arg15[%c0_11, %c0_12, %c0_13], %15 {strides = array<i32>} : memref<12x20x4xbf16, #tpu.memory_space<vmem>>, vector<12x2x4xbf16>,
    %c0_14 = arith.constant 0 : index
    %c18 = arith.constant 18 : index
    %c0_15 = arith.constant 0 : index
    %17 = vector.load %arg15[%c0_14, %c18, %c0_15] : memref<12x20x4xbf16, #tpu.memory_space<vmem>>, vector<12x2x4xbf16>
    tpu.vector_store %arg15[%c0_14, %c18, %c0_15], %15 {strides = array<i32>} : memref<12x20x4xbf16, #tpu.memory_space<vmem>>, vector<12x2x4xbf16>,
    %c2 = arith.constant 2 : index
    %c2_16 = arith.constant 2 : index
    %c0_17 = arith.constant 0 : index
    %18 = vector.load %arg15[%c2, %c2_16, %c0_17] : memref<12x20x4xbf16, #tpu.memory_space<vmem>>, vector<8x16x4xbf16>
    tpu.vector_store %arg15[%c2, %c2_16, %c0_17], %14 {strides = array<i32>} : memref<12x20x4xbf16, #tpu.memory_space<vmem>>, vector<8x16x4xbf16>,
    %cst_18 = arith.constant 0.000000e+00 : bf16
    %19 = vector.broadcast %cst_18 : bf16 to vector<2x16x4xbf16>
    %c0_i32 = arith.constant 0 : i32
    %20 = arith.cmpi sgt, %arg1, %c0_i32 : i32
    %21 = arith.extui %20 : i1 to i32
    %c0_i32_19 = arith.constant 0 : i32
    %22 = arith.cmpi ne, %21, %c0_i32_19 : i32
    scf.if %22 {
      %c0_62 = arith.constant 0 : index
      %c0_63 = arith.constant 0 : index
      %c0_64 = arith.constant 0 : index
      %c0_65 = arith.constant 0 : index
      %112 = vector.load %arg3[%c0_62, %c0_63, %c0_64, %c0_65] : memref<1x2x16x8xf32, #tpu.memory_space<vmem>>, vector<1x2x16x8xf32>
      %113 = vector.shape_cast %112 : vector<1x2x16x8xf32> to vector<32x8xf32>
      %114 = arith.truncf %113 : vector<32x8xf32> to vector<32x8xbf16>
      %cst_66 = arith.constant dense<0.000000e+00> : vector<32x4xf32>
      %115 = tpu.matmul %114, %0, %cst_66 {dimension_numbers = #tpu.dot_dimension_numbers<[1], [0], [0], [1], [0, 0, 1, 1], [], []>} : vector<32x8xbf16>, vector<8x4xbf16>, vector<32x4xf32> -> vector<32x4xf32>
      %116 = vector.broadcast %1 : vector<1x4xf32> to vector<32x4xf32>
      %117 = arith.mulf %115, %116 : vector<32x4xf32>
      %118 = vector.broadcast %2 : vector<1x4xf32> to vector<32x4xf32>
      %119 = arith.addf %117, %118 : vector<32x4xf32>
      %cst_67 = arith.constant 0.000000e+00 : f32
      %120 = vector.broadcast %cst_67 : f32 to vector<32x4xf32>
      %121 = arith.maximumf %119, %120 : vector<32x4xf32>
      %122 = vector.shape_cast %121 : vector<32x4xf32> to vector<2x16x4xf32>
      %123 = arith.truncf %122 : vector<2x16x4xf32> to vector<2x16x4xbf16>
      %c0_68 = arith.constant 0 : index
      %c2_69 = arith.constant 2 : index
      %c0_70 = arith.constant 0 : index
      %124 = vector.load %arg15[%c0_68, %c2_69, %c0_70] : memref<12x20x4xbf16, #tpu.memory_space<vmem>>, vector<2x16x4xbf16>
      tpu.vector_store %arg15[%c0_68, %c2_69, %c0_70], %123 {strides = array<i32>} : memref<12x20x4xbf16, #tpu.memory_space<vmem>>, vector<2x16x4xbf16>,
    } else {
    }
    %c0_i32_20 = arith.constant 0 : i32
    %23 = arith.cmpi eq, %arg1, %c0_i32_20 : i32
    %24 = arith.extui %23 : i1 to i32
    %c0_i32_21 = arith.constant 0 : i32
    %25 = arith.cmpi ne, %24, %c0_i32_21 : i32
    scf.if %25 {
      %c0_62 = arith.constant 0 : index
      %c2_63 = arith.constant 2 : index
      %c0_64 = arith.constant 0 : index
      %112 = vector.load %arg15[%c0_62, %c2_63, %c0_64] : memref<12x20x4xbf16, #tpu.memory_space<vmem>>, vector<2x16x4xbf16>
      tpu.vector_store %arg15[%c0_62, %c2_63, %c0_64], %19 {strides = array<i32>} : memref<12x20x4xbf16, #tpu.memory_space<vmem>>, vector<2x16x4xbf16>,
    } else {
    }
    %c1_i32 = arith.constant 1 : i32
    %26 = arith.cmpi slt, %arg1, %c1_i32 : i32
    %27 = arith.extui %26 : i1 to i32
    %c0_i32_22 = arith.constant 0 : i32
    %28 = arith.cmpi ne, %27, %c0_i32_22 : i32
    scf.if %28 {
      %c0_62 = arith.constant 0 : index
      %c0_63 = arith.constant 0 : index
      %c0_64 = arith.constant 0 : index
      %c0_65 = arith.constant 0 : index
      %112 = vector.load %arg4[%c0_62, %c0_63, %c0_64, %c0_65] : memref<1x2x16x8xf32, #tpu.memory_space<vmem>>, vector<1x2x16x8xf32>
      %113 = vector.shape_cast %112 : vector<1x2x16x8xf32> to vector<32x8xf32>
      %114 = arith.truncf %113 : vector<32x8xf32> to vector<32x8xbf16>
      %cst_66 = arith.constant dense<0.000000e+00> : vector<32x4xf32>
      %115 = tpu.matmul %114, %0, %cst_66 {dimension_numbers = #tpu.dot_dimension_numbers<[1], [0], [0], [1], [0, 0, 1, 1], [], []>} : vector<32x8xbf16>, vector<8x4xbf16>, vector<32x4xf32> -> vector<32x4xf32>
      %116 = vector.broadcast %1 : vector<1x4xf32> to vector<32x4xf32>
      %117 = arith.mulf %115, %116 : vector<32x4xf32>
      %118 = vector.broadcast %2 : vector<1x4xf32> to vector<32x4xf32>
      %119 = arith.addf %117, %118 : vector<32x4xf32>
      %cst_67 = arith.constant 0.000000e+00 : f32
      %120 = vector.broadcast %cst_67 : f32 to vector<32x4xf32>
      %121 = arith.maximumf %119, %120 : vector<32x4xf32>
      %122 = vector.shape_cast %121 : vector<32x4xf32> to vector<2x16x4xf32>
      %123 = arith.truncf %122 : vector<2x16x4xf32> to vector<2x16x4xbf16>
      %c10 = arith.constant 10 : index
      %c2_68 = arith.constant 2 : index
      %c0_69 = arith.constant 0 : index
      %124 = vector.load %arg15[%c10, %c2_68, %c0_69] : memref<12x20x4xbf16, #tpu.memory_space<vmem>>, vector<2x16x4xbf16>
      tpu.vector_store %arg15[%c10, %c2_68, %c0_69], %123 {strides = array<i32>} : memref<12x20x4xbf16, #tpu.memory_space<vmem>>, vector<2x16x4xbf16>,
    } else {
    }
    %c1_i32_23 = arith.constant 1 : i32
    %29 = arith.cmpi eq, %arg1, %c1_i32_23 : i32
    %30 = arith.extui %29 : i1 to i32
    %c0_i32_24 = arith.constant 0 : i32
    %31 = arith.cmpi ne, %30, %c0_i32_24 : i32
    scf.if %31 {
      %c10 = arith.constant 10 : index
      %c2_62 = arith.constant 2 : index
      %c0_63 = arith.constant 0 : index
      %112 = vector.load %arg15[%c10, %c2_62, %c0_63] : memref<12x20x4xbf16, #tpu.memory_space<vmem>>, vector<2x16x4xbf16>
      tpu.vector_store %arg15[%c10, %c2_62, %c0_63], %19 {strides = array<i32>} : memref<12x20x4xbf16, #tpu.memory_space<vmem>>, vector<2x16x4xbf16>,
    } else {
    }
    %c0_25 = arith.constant 0 : index
    %c0_26 = arith.constant 0 : index
    %c0_27 = arith.constant 0 : index
    %32 = vector.load %arg8[%c0_25, %c0_26, %c0_27] : memref<9x4x4xbf16, #tpu.memory_space<vmem>>, vector<9x4x4xbf16>
    %c0_28 = arith.constant 0 : index
    %c0_29 = arith.constant 0 : index
    %c0_30 = arith.constant 0 : index
    %33 = vector.load %arg15[%c0_28, %c0_29, %c0_30] : memref<12x20x4xbf16, #tpu.memory_space<vmem>>, vector<12x16x4xbf16>
    %34 = vector.extract_strided_slice %33 {offsets = [0, 0, 0], sizes = [8, 16, 4], strides = [1, 1, 1]} : vector<12x16x4xbf16> to vector<8x16x4xbf16>
    %35 = vector.shape_cast %34 : vector<8x16x4xbf16> to vector<128x4xbf16>
    %36 = vector.extract_strided_slice %32 {offsets = [0, 0, 0], sizes = [1, 4, 4], strides = [1, 1, 1]} : vector<9x4x4xbf16> to vector<1x4x4xbf16>
    %37 = vector.shape_cast %36 : vector<1x4x4xbf16> to vector<4x4xbf16>
    %cst_31 = arith.constant dense<0.000000e+00> : vector<128x4xf32>
    %38 = tpu.matmul %35, %37, %cst_31 {dimension_numbers = #tpu.dot_dimension_numbers<[1], [0], [0], [1], [0, 0, 1, 1], [], []>} : vector<128x4xbf16>, vector<4x4xbf16>, vector<128x4xf32> -> vector<128x4xf32>
    %39 = vector.extract_strided_slice %33 {offsets = [2, 0, 0], sizes = [8, 16, 4], strides = [1, 1, 1]} : vector<12x16x4xbf16> to vector<8x16x4xbf16>
    %40 = vector.shape_cast %39 : vector<8x16x4xbf16> to vector<128x4xbf16>
    %41 = vector.extract_strided_slice %32 {offsets = [3, 0, 0], sizes = [1, 4, 4], strides = [1, 1, 1]} : vector<9x4x4xbf16> to vector<1x4x4xbf16>
    %42 = vector.shape_cast %41 : vector<1x4x4xbf16> to vector<4x4xbf16>
    %cst_32 = arith.constant dense<0.000000e+00> : vector<128x4xf32>
    %43 = tpu.matmul %40, %42, %cst_32 {dimension_numbers = #tpu.dot_dimension_numbers<[1], [0], [0], [1], [0, 0, 1, 1], [], []>} : vector<128x4xbf16>, vector<4x4xbf16>, vector<128x4xf32> -> vector<128x4xf32>
    %44 = arith.addf %38, %43 : vector<128x4xf32>
    %45 = vector.extract_strided_slice %33 {offsets = [4, 0, 0], sizes = [8, 16, 4], strides = [1, 1, 1]} : vector<12x16x4xbf16> to vector<8x16x4xbf16>
    %46 = vector.shape_cast %45 : vector<8x16x4xbf16> to vector<128x4xbf16>
    %47 = vector.extract_strided_slice %32 {offsets = [6, 0, 0], sizes = [1, 4, 4], strides = [1, 1, 1]} : vector<9x4x4xbf16> to vector<1x4x4xbf16>
    %48 = vector.shape_cast %47 : vector<1x4x4xbf16> to vector<4x4xbf16>
    %cst_33 = arith.constant dense<0.000000e+00> : vector<128x4xf32>
    %49 = tpu.matmul %46, %48, %cst_33 {dimension_numbers = #tpu.dot_dimension_numbers<[1], [0], [0], [1], [0, 0, 1, 1], [], []>} : vector<128x4xbf16>, vector<4x4xbf16>, vector<128x4xf32> -> vector<128x4xf32>
    %50 = arith.addf %44, %49 : vector<128x4xf32>
    %c0_34 = arith.constant 0 : index
    %c2_35 = arith.constant 2 : index
    %c0_36 = arith.constant 0 : index
    %51 = vector.load %arg15[%c0_34, %c2_35, %c0_36] : memref<12x20x4xbf16, #tpu.memory_space<vmem>>, vector<12x16x4xbf16>
    %52 = vector.extract_strided_slice %51 {offsets = [0, 0, 0], sizes = [8, 16, 4], strides = [1, 1, 1]} : vector<12x16x4xbf16> to vector<8x16x4xbf16>
    %53 = vector.shape_cast %52 : vector<8x16x4xbf16> to vector<128x4xbf16>
    %54 = vector.extract_strided_slice %32 {offsets = [1, 0, 0], sizes = [1, 4, 4], strides = [1, 1, 1]} : vector<9x4x4xbf16> to vector<1x4x4xbf16>
    %55 = vector.shape_cast %54 : vector<1x4x4xbf16> to vector<4x4xbf16>
    %cst_37 = arith.constant dense<0.000000e+00> : vector<128x4xf32>
    %56 = tpu.matmul %53, %55, %cst_37 {dimension_numbers = #tpu.dot_dimension_numbers<[1], [0], [0], [1], [0, 0, 1, 1], [], []>} : vector<128x4xbf16>, vector<4x4xbf16>, vector<128x4xf32> -> vector<128x4xf32>
    %57 = arith.addf %50, %56 : vector<128x4xf32>
    %58 = vector.extract_strided_slice %51 {offsets = [2, 0, 0], sizes = [8, 16, 4], strides = [1, 1, 1]} : vector<12x16x4xbf16> to vector<8x16x4xbf16>
    %59 = vector.shape_cast %58 : vector<8x16x4xbf16> to vector<128x4xbf16>
    %60 = vector.extract_strided_slice %32 {offsets = [4, 0, 0], sizes = [1, 4, 4], strides = [1, 1, 1]} : vector<9x4x4xbf16> to vector<1x4x4xbf16>
    %61 = vector.shape_cast %60 : vector<1x4x4xbf16> to vector<4x4xbf16>
    %cst_38 = arith.constant dense<0.000000e+00> : vector<128x4xf32>
    %62 = tpu.matmul %59, %61, %cst_38 {dimension_numbers = #tpu.dot_dimension_numbers<[1], [0], [0], [1], [0, 0, 1, 1], [], []>} : vector<128x4xbf16>, vector<4x4xbf16>, vector<128x4xf32> -> vector<128x4xf32>
    %63 = arith.addf %57, %62 : vector<128x4xf32>
    %64 = vector.extract_strided_slice %51 {offsets = [4, 0, 0], sizes = [8, 16, 4], strides = [1, 1, 1]} : vector<12x16x4xbf16> to vector<8x16x4xbf16>
    %65 = vector.shape_cast %64 : vector<8x16x4xbf16> to vector<128x4xbf16>
    %66 = vector.extract_strided_slice %32 {offsets = [7, 0, 0], sizes = [1, 4, 4], strides = [1, 1, 1]} : vector<9x4x4xbf16> to vector<1x4x4xbf16>
    %67 = vector.shape_cast %66 : vector<1x4x4xbf16> to vector<4x4xbf16>
    %cst_39 = arith.constant dense<0.000000e+00> : vector<128x4xf32>
    %68 = tpu.matmul %65, %67, %cst_39 {dimension_numbers = #tpu.dot_dimension_numbers<[1], [0], [0], [1], [0, 0, 1, 1], [], []>} : vector<128x4xbf16>, vector<4x4xbf16>, vector<128x4xf32> -> vector<128x4xf32>
    %69 = arith.addf %63, %68 : vector<128x4xf32>
    %c0_40 = arith.constant 0 : index
    %c4 = arith.constant 4 : index
    %c0_41 = arith.constant 0 : index
    %70 = vector.load %arg15[%c0_40, %c4, %c0_41] : memref<12x20x4xbf16, #tpu.memory_space<vmem>>, vector<12x16x4xbf16>
    %71 = vector.extract_strided_slice %70 {offsets = [0, 0, 0], sizes = [8, 16, 4], strides = [1, 1, 1]} : vector<12x16x4xbf16> to vector<8x16x4xbf16>
    %72 = vector.shape_cast %71 : vector<8x16x4xbf16> to vector<128x4xbf16>
    %73 = vector.extract_strided_slice %32 {offsets = [2, 0, 0], sizes = [1, 4, 4], strides = [1, 1, 1]} : vector<9x4x4xbf16> to vector<1x4x4xbf16>
    %74 = vector.shape_cast %73 : vector<1x4x4xbf16> to vector<4x4xbf16>
    %cst_42 = arith.constant dense<0.000000e+00> : vector<128x4xf32>
    %75 = tpu.matmul %72, %74, %cst_42 {dimension_numbers = #tpu.dot_dimension_numbers<[1], [0], [0], [1], [0, 0, 1, 1], [], []>} : vector<128x4xbf16>, vector<4x4xbf16>, vector<128x4xf32> -> vector<128x4xf32>
    %76 = arith.addf %69, %75 : vector<128x4xf32>
    %77 = vector.extract_strided_slice %70 {offsets = [2, 0, 0], sizes = [8, 16, 4], strides = [1, 1, 1]} : vector<12x16x4xbf16> to vector<8x16x4xbf16>
    %78 = vector.shape_cast %77 : vector<8x16x4xbf16> to vector<128x4xbf16>
    %79 = vector.extract_strided_slice %32 {offsets = [5, 0, 0], sizes = [1, 4, 4], strides = [1, 1, 1]} : vector<9x4x4xbf16> to vector<1x4x4xbf16>
    %80 = vector.shape_cast %79 : vector<1x4x4xbf16> to vector<4x4xbf16>
    %cst_43 = arith.constant dense<0.000000e+00> : vector<128x4xf32>
    %81 = tpu.matmul %78, %80, %cst_43 {dimension_numbers = #tpu.dot_dimension_numbers<[1], [0], [0], [1], [0, 0, 1, 1], [], []>} : vector<128x4xbf16>, vector<4x4xbf16>, vector<128x4xf32> -> vector<128x4xf32>
    %82 = arith.addf %76, %81 : vector<128x4xf32>
    %83 = vector.extract_strided_slice %70 {offsets = [4, 0, 0], sizes = [8, 16, 4], strides = [1, 1, 1]} : vector<12x16x4xbf16> to vector<8x16x4xbf16>
    %84 = vector.shape_cast %83 : vector<8x16x4xbf16> to vector<128x4xbf16>
    %85 = vector.extract_strided_slice %32 {offsets = [8, 0, 0], sizes = [1, 4, 4], strides = [1, 1, 1]} : vector<9x4x4xbf16> to vector<1x4x4xbf16>
    %86 = vector.shape_cast %85 : vector<1x4x4xbf16> to vector<4x4xbf16>
    %cst_44 = arith.constant dense<0.000000e+00> : vector<128x4xf32>
    %87 = tpu.matmul %84, %86, %cst_44 {dimension_numbers = #tpu.dot_dimension_numbers<[1], [0], [0], [1], [0, 0, 1, 1], [], []>} : vector<128x4xbf16>, vector<4x4xbf16>, vector<128x4xf32> -> vector<128x4xf32>
    %88 = arith.addf %82, %87 : vector<128x4xf32>
    %c0_45 = arith.constant 0 : index
    %c0_46 = arith.constant 0 : index
    %89 = vector.load %arg9[%c0_45, %c0_46] : memref<1x4xf32, #tpu.memory_space<vmem>>, vector<1x4xf32>
    %90 = vector.broadcast %89 : vector<1x4xf32> to vector<128x4xf32>
    %91 = arith.mulf %88, %90 : vector<128x4xf32>
    %c0_47 = arith.constant 0 : index
    %c0_48 = arith.constant 0 : index
    %92 = vector.load %arg10[%c0_47, %c0_48] : memref<1x4xf32, #tpu.memory_space<vmem>>, vector<1x4xf32>
    %93 = vector.broadcast %92 : vector<1x4xf32> to vector<128x4xf32>
    %94 = arith.addf %91, %93 : vector<128x4xf32>
    %cst_49 = arith.constant 0.000000e+00 : f32
    %95 = vector.broadcast %cst_49 : f32 to vector<128x4xf32>
    %96 = arith.maximumf %94, %95 : vector<128x4xf32>
    %97 = arith.truncf %96 : vector<128x4xf32> to vector<128x4xbf16>
    %c0_50 = arith.constant 0 : index
    %c0_51 = arith.constant 0 : index
    %98 = vector.load %arg11[%c0_50, %c0_51] : memref<4x8xbf16, #tpu.memory_space<vmem>>, vector<4x8xbf16>
    %cst_52 = arith.constant dense<0.000000e+00> : vector<128x8xf32>
    %99 = tpu.matmul %97, %98, %cst_52 {dimension_numbers = #tpu.dot_dimension_numbers<[1], [0], [0], [1], [0, 0, 1, 1], [], []>} : vector<128x4xbf16>, vector<4x8xbf16>, vector<128x8xf32> -> vector<128x8xf32>
    %c0_53 = arith.constant 0 : index
    %c0_54 = arith.constant 0 : index
    %100 = vector.load %arg12[%c0_53, %c0_54] : memref<1x8xf32, #tpu.memory_space<vmem>>, vector<1x8xf32>
    %101 = vector.broadcast %100 : vector<1x8xf32> to vector<128x8xf32>
    %102 = arith.mulf %99, %101 : vector<128x8xf32>
    %c0_55 = arith.constant 0 : index
    %c0_56 = arith.constant 0 : index
    %103 = vector.load %arg13[%c0_55, %c0_56] : memref<1x8xf32, #tpu.memory_space<vmem>>, vector<1x8xf32>
    %104 = vector.broadcast %103 : vector<1x8xf32> to vector<128x8xf32>
    %105 = arith.addf %102, %104 : vector<128x8xf32>
    %106 = vector.shape_cast %3 : vector<1x8x16x8xf32> to vector<128x8xf32>
    %107 = arith.addf %105, %106 : vector<128x8xf32>
    %cst_57 = arith.constant 0.000000e+00 : f32
    %108 = vector.broadcast %cst_57 : f32 to vector<128x8xf32>
    %109 = arith.maximumf %107, %108 : vector<128x8xf32>
    %110 = vector.shape_cast %109 : vector<128x8xf32> to vector<1x8x16x8xf32>
    %c0_58 = arith.constant 0 : index
    %c0_59 = arith.constant 0 : index
    %c0_60 = arith.constant 0 : index
    %c0_61 = arith.constant 0 : index
    %111 = vector.load %arg14[%c0_58, %c0_59, %c0_60, %c0_61] : memref<1x8x16x8xf32, #tpu.memory_space<vmem>>, vector<1x8x16x8xf32>
    tpu.vector_store %arg14[%c0_58, %c0_59, %c0_60, %c0_61], %110 {strides = array<i32>} : memref<1x8x16x8xf32, #tpu.memory_space<vmem>>, vector<1x8x16x8xf32>,
    return
  }
  func.func @transform_0(%arg0: i32, %arg1: i32) -> (i32, i32, i32, i32) {
    %c0_i32 = arith.constant 0 : i32
    %c0_i32_0 = arith.constant 0 : i32
    %c0_i32_1 = arith.constant 0 : i32
    return %arg0, %arg1, %c0_i32, %c0_i32_0 : i32, i32, i32, i32
  }
  func.func @transform_1(%arg0: i32, %arg1: i32) -> (i32, i32, i32, i32) {
    %c4_i32 = arith.constant 4 : i32
    %0 = arith.muli %arg1, %c4_i32 : i32
    %c1_i32 = arith.constant 1 : i32
    %1 = arith.subi %0, %c1_i32 : i32
    %c0_i32 = arith.constant 0 : i32
    %2 = arith.maxsi %1, %c0_i32 : i32
    %c0_i32_0 = arith.constant 0 : i32
    %c0_i32_1 = arith.constant 0 : i32
    %c0_i32_2 = arith.constant 0 : i32
    return %arg0, %2, %c0_i32_0, %c0_i32_1 : i32, i32, i32, i32
  }
  func.func @transform_2(%arg0: i32, %arg1: i32) -> (i32, i32, i32, i32) {
    %c1_i32 = arith.constant 1 : i32
    %0 = arith.addi %arg1, %c1_i32 : i32
    %c4_i32 = arith.constant 4 : i32
    %1 = arith.muli %0, %c4_i32 : i32
    %c7_i32 = arith.constant 7 : i32
    %2 = arith.minsi %1, %c7_i32 : i32
    %c0_i32 = arith.constant 0 : i32
    %c0_i32_0 = arith.constant 0 : i32
    %c0_i32_1 = arith.constant 0 : i32
    return %arg0, %2, %c0_i32, %c0_i32_0 : i32, i32, i32, i32
  }
  func.func @transform_3(%arg0: i32, %arg1: i32) -> (i32, i32) {
    %c0_i32 = arith.constant 0 : i32
    %c0_i32_0 = arith.constant 0 : i32
    %c0_i32_1 = arith.constant 0 : i32
    return %c0_i32, %c0_i32_0 : i32, i32
  }
  func.func @transform_4(%arg0: i32, %arg1: i32) -> (i32, i32) {
    %c0_i32 = arith.constant 0 : i32
    %c0_i32_0 = arith.constant 0 : i32
    %c0_i32_1 = arith.constant 0 : i32
    return %c0_i32, %c0_i32_0 : i32, i32
  }
  func.func @transform_5(%arg0: i32, %arg1: i32) -> (i32, i32) {
    %c0_i32 = arith.constant 0 : i32
    %c0_i32_0 = arith.constant 0 : i32
    %c0_i32_1 = arith.constant 0 : i32
    return %c0_i32, %c0_i32_0 : i32, i32
  }
  func.func @transform_6(%arg0: i32, %arg1: i32) -> (i32, i32, i32) {
    %c0_i32 = arith.constant 0 : i32
    %c0_i32_0 = arith.constant 0 : i32
    %c0_i32_1 = arith.constant 0 : i32
    %c0_i32_2 = arith.constant 0 : i32
    return %c0_i32, %c0_i32_0, %c0_i32_1 : i32, i32, i32
  }
  func.func @transform_7(%arg0: i32, %arg1: i32) -> (i32, i32) {
    %c0_i32 = arith.constant 0 : i32
    %c0_i32_0 = arith.constant 0 : i32
    %c0_i32_1 = arith.constant 0 : i32
    return %c0_i32, %c0_i32_0 : i32, i32
  }
  func.func @transform_8(%arg0: i32, %arg1: i32) -> (i32, i32) {
    %c0_i32 = arith.constant 0 : i32
    %c0_i32_0 = arith.constant 0 : i32
    %c0_i32_1 = arith.constant 0 : i32
    return %c0_i32, %c0_i32_0 : i32, i32
  }
  func.func @transform_9(%arg0: i32, %arg1: i32) -> (i32, i32) {
    %c0_i32 = arith.constant 0 : i32
    %c0_i32_0 = arith.constant 0 : i32
    %c0_i32_1 = arith.constant 0 : i32
    return %c0_i32, %c0_i32_0 : i32, i32
  }
  func.func @transform_10(%arg0: i32, %arg1: i32) -> (i32, i32) {
    %c0_i32 = arith.constant 0 : i32
    %c0_i32_0 = arith.constant 0 : i32
    %c0_i32_1 = arith.constant 0 : i32
    return %c0_i32, %c0_i32_0 : i32, i32
  }
  func.func @transform_11(%arg0: i32, %arg1: i32) -> (i32, i32) {
    %c0_i32 = arith.constant 0 : i32
    %c0_i32_0 = arith.constant 0 : i32
    %c0_i32_1 = arith.constant 0 : i32
    return %c0_i32, %c0_i32_0 : i32, i32
  }
  func.func @transform_12(%arg0: i32, %arg1: i32) -> (i32, i32, i32, i32) {
    %c0_i32 = arith.constant 0 : i32
    %c0_i32_0 = arith.constant 0 : i32
    %c0_i32_1 = arith.constant 0 : i32
    return %arg0, %arg1, %c0_i32, %c0_i32_0 : i32, i32, i32, i32
  }
}

</mosaic_0001>

<bundles_post_ra>
// kernel: tpu_custom_call.1
= control target key start
LH: loop header
LB: loop body
LE: loop exit
PB: predicated region body
PF: predicated region fallthrough
CT: control target
= control target key end

     0   :  { %s3971_s21 = smov 0   ;;  %s3973_s22 = smov 0   ;;  %s4982_s0 = inlined_call_operand.vmem [shape: f32[2,16,16,8], index: 0, kind: input, shape index: {}]   ;;  %s4983_s1 = inlined_call_operand.vmem [shape: f32[2,16,16,8], index: 1, kind: input, shape index: {}]   ;;  %s4984_s2 = inlined_call_operand.vmem [shape: f32[2,16,16,8], index: 2, kind: input, shape index: {}]   ;;  %s4985_s3 = inlined_call_operand.vmem [shape: bf16[8,4], index: 3, kind: input, shape index: {}]   ;;  %s4986_s4 = inlined_call_operand.vmem [shape: f32[1,4], index: 4, kind: input, shape index: {}]   ;;  %s4987_s5 = inlined_call_operand.vmem [shape: f32[1,4], index: 5, kind: input, shape index: {}]   ;;  %s4988_s6 = inlined_call_operand.vmem [shape: bf16[9,4,4], index: 6, kind: input, shape index: {}]   ;;  %s4989_s7 = inlined_call_operand.vmem [shape: f32[1,4], index: 7, kind: input, shape index: {}]   ;;  %s4990_s8 = inlined_call_operand.vmem [shape: f32[1,4], index: 8, kind: input, shape index: {}]   ;;  %s4991_s9 = inlined_call_operand.vmem [shape: bf16[4,8], index: 9, kind: input, shape index: {}]   ;;  %s4992_s10 = inlined_call_operand.vmem [shape: f32[1,8], index: 10, kind: input, shape index: {}]   ;;  %s4993_s11 = inlined_call_operand.vmem [shape: f32[1,8], index: 11, kind: input, shape index: {}]   ;;  %s4994_s12 = inlined_call_operand.vmem [shape: f32[2,16,16,8], index: 12, kind: output, shape index: {}]  }
   0x1   :  { %5011 = sst [smem:[#allocation44_spill]] %s4982_s0  ;;  %s3975_s23 = smov 0  }
   0x2   :  { %5012 = sst [smem:[#allocation45_spill]] %s4985_s3  ;;  %s3977_s24 = smov 0  }
   0x3   :  { %s3979_s25 = smov 0  }
   0x4 LB: > { %s31_s26 = sadd.s32 1, %s3893_s23  ;;  %s34_s27 = sadd.s32 1, %s3897_s24  ;;  %s3901_s25 = sphi %s3979_s25, %s22_s25   ;;  %s3897_s24 = sphi %s3977_s24, %s5106_s24   ;;  %s3893_s23 = sphi %s3975_s23, %s5105_s23   ;;  %s3889_s22 = sphi %s3973_s22, %s5104_s22   ;;  %s3885_s21 = sphi %s3971_s21, %s5103_s21  }
   0x5   : > { %p32_p0 = scmp.ge.s32.totalorder %s31_s26, 2  ;;  %p3239_p1 = scmp.ge.s32.totalorder %s3901_s25, 1 }
   0x6   : > { %p452_p2 = scmp.lt.s32.totalorder %s3901_s25, 5 }
   0x7   : > { %s5108_s26 = smov (%p32_p0, %s31_s26), 0  ;;  %s5110_s27 = smov (!%p32_p0, %s34_s27), %s3897_s24 }
   0x8   : > { %p453_p3 = pnand %p3239_p1, %p452_p2  ;;  %p36_p4 = scmp.ge.s32.totalorder %s5110_s27, 2 }
   0xa   : > { %s5112_s27 = smov (%p36_p4, %s5110_s27), 0  ;;  %456 = sbr.rel (%p453_p3) target bundleno = 1292 (0x50c), region = 68 }
   0xb   : > { %5013 = sst [smem:[#allocation3_spill]] %s5112_s27 }
   0xf   : > { %s5014_s3 = sld [smem:[#allocation45_spill]]  ;;  %vm645_vm0 = vcmask 1043456   ;;  %s3240_s30 = sshll.u32 %s3885_s21, 3  ;;  %vm620_vm1 = vcmask 64512   ;;  %vm814_vm2 = vcmask 24576   ;;  %vm827_vm3 = vcmask 25601  }
  0x10   : > { %p533_p5 = scmp.lt.s32.totalorder %s3889_s22, 1  ;;  %p535_p6 = scmp.lt.s32.totalorder %s3240_s30, 15  ;;  %v3903_v26 = vmov 0   ;;  %v4144_v27 = vld [vmem:[%s4986_s4] ss:$0 sm:$0xff]  ;;  %vm948_vm4 = vcmask 27649  }
  0x11   : > { %s3244_s13 = sshll.u32 %s3885_s21, 2  ;;  %s5015_s0 = sld [smem:[#allocation44_spill]]  ;;  %815 = vst.msk [vmem:[#allocation2] sm:$0x1] %vm814_vm2, %v3903_v26  ;;  %816 = vst.msk [vmem:[#allocation2 + $0xc] sm:$0x1] %vm814_vm2, %v3903_v26 }
  0x12   : > { %s5114_s22 = smov (!%p533_p5, %s3889_s22), 1  ;;  %s5116_s30 = smov (!%p535_p6, %s3240_s30), 15  ;;  %817 = vst.msk [vmem:[#allocation2 + $0x18] sm:$0x1] %vm814_vm2, %v3903_v26  ;;  %818 = vst.msk [vmem:[#allocation2 + $0x24] sm:$0x1] %vm814_vm2, %v3903_v26 }
  0x13   : > { %s4020_s14 = sshll.u32 %s5114_s22, 5  ;;  %s3245_s15 = sadd.s32 4294967295, %s3244_s13  ;;  %819 = vst.msk [vmem:[#allocation2 + $0x30] sm:$0x1] %vm814_vm2, %v3903_v26  ;;  %820 = vst.msk [vmem:[#allocation2 + $0x3c] sm:$0x1] %vm814_vm2, %v3903_v26 }
  0x14   : > { %s3241_s16 = sshll.u32 %s5116_s30, 1  ;;  %p545_p7 = scmp.gt.s32.totalorder %s3245_s15, 0  ;;  %821 = vst.msk [vmem:[#allocation2 + $0x48] sm:$0x1] %vm814_vm2, %v3903_v26  ;;  %822 = vst.msk [vmem:[#allocation2 + $0x54] sm:$0x1] %vm814_vm2, %v3903_v26 }
  0x15   : > { %v4006_v0 = vld [vmem:[%s5014_s3] sm:$0xf]  ;;  %s539_s17 = sadd.s32 %s4020_s14, %s3241_s16  ;;  %s3452_s18 = sadd.s32 4, %s3244_s13  ;;  %823 = vst.msk [vmem:[#allocation2 + $0x60] sm:$0x1] %vm814_vm2, %v3903_v26  ;;  %vm880_vm5 = vcmask 1040384  }
  0x16   : > { %3794 = vmatprep.subr.msk.bf16.mxu0 %vm645_vm0, %v4006_v0  ;;  %3795 = vmatprep.subr.msk.bf16.mxu1 %vm645_vm0, %v4006_v0  ;;  %v4015_v1 = vsel %vm645_vm0, %v4006_v0, 0  ;;  %s3243_s19 = sshll.u32 %s539_s17, 3  ;;  %p564_p8 = scmp.lt.s32.totalorder %s3452_s18, 7  ;;  %824 = vst.msk [vmem:[#allocation2 + $0x6c] sm:$0x1] %vm814_vm2, %v3903_v26  ;;  %vm881_vm6 = vcmask 1044484  }
  0x17   : > { %3583 = vmatpush3.bf16.msra.mxu0 %v4015_v1  ;;  %3793 = vmatpush3.bf16.msra.mxu1 %v4015_v1  ;;  %s4026_s29 = scalar_lea.vmem %s5015_s0, %s3243_s19  ;;  %s4031_s22 = scalar_lea.vmem %s4994_s12, %s3243_s19  ;;  %825 = vst.msk [vmem:[#allocation2 + $0x78] sm:$0x1] %vm814_vm2, %v3903_v26  ;;  %826 = vst.msk [vmem:[#allocation2 + $0x84] sm:$0x1] %vm814_vm2, %v3903_v26  ;;  %v4149_v28 = vld [vmem:[%s4987_s5] ss:$0 sm:$0xff] }
  0x18   : > { %s5118_s15 = smov (!%p545_p7, %s3245_s15), 0  ;;  %v4034_v2 = vld [vmem:[%s4026_s29] sm:$0xff]  ;;  %v4037_v3 = vld [vmem:[%s4026_s29 + $0x8] sm:$0xff]  ;;  %s5120_s18 = smov (!%p564_p8, %s3452_s18), 7  ;;  %v4048_v7 = vld [vmem:[%s4026_s29 + $0x10] sm:$0xff]  ;;  %vm950_vm7 = vcmask 27648  }
  0x19   : > { %5016 = vst [vmem:[#allocation4_spill] sm:$0xff] %v4034_v2  ;;  %5017 = vst [vmem:[#allocation5_spill] sm:$0xff] %v4037_v3  ;;  %v4040_v4 = vld [vmem:[%s4026_s29 + $0x40] sm:$0xff]  ;;  %v612_v5 = vpack.c.bf16 %v4037_v3, %v4034_v2  ;;  %v4045_v6 = vld [vmem:[%s4026_s29 + $0x48] sm:$0xff]  ;;  %s3246_s3 = sshll.u32 %s5118_s15, 1  ;;  %s3251_s27 = sshll.u32 %s5120_s18, 1 }
  0x1a   : > { %5018 = vst [vmem:[#allocation6_spill] sm:$0xff] %v4040_v4  ;;  %5019 = vst [vmem:[#allocation7_spill] sm:$0xff] %v4045_v6  ;;  %v4051_v8 = vld [vmem:[%s4026_s29 + $0x18] sm:$0xff]  ;;  %v616_v9 = vpack.c.bf16 %v4045_v6, %v4040_v4  ;;  %v4058_v11 = vld [vmem:[%s4026_s29 + $0x50] sm:$0xff]  ;;  %p550_p9 = scmp.lt.s32.totalorder %s3246_s3, 15  ;;  %p569_p10 = scmp.lt.s32.totalorder %s3251_s27, 15 }
  0x1b   : > { %5020 = vst [vmem:[#allocation8_spill] sm:$0xff] %v4048_v7  ;;  %5021 = vst [vmem:[#allocation9_spill] sm:$0xff] %v4051_v8  ;;  %v613_v10 = vpack.c.bf16 %v4051_v8, %v4048_v7  ;;  %v4061_v12 = vld [vmem:[%s4026_s29 + $0x58] sm:$0xff]  ;;  %v4064_v13 = vld [vmem:[%s4026_s29 + $0x20] sm:$0xff]  ;;  %3584 = vmatprep.mubr.msk.bf16.mxu0 %vm620_vm1, %v612_v5  ;;  %p3285_p11 = scmp.le.s32.totalorder %s3885_s21, 0 }
  0x1c   : > { %5022 = vst [vmem:[#allocation10_spill] sm:$0xff] %v4058_v11  ;;  %5023 = vst [vmem:[#allocation11_spill] sm:$0xff] %v4061_v12  ;;  %v617_v14 = vpack.c.bf16 %v4061_v12, %v4058_v11  ;;  %v4070_v15 = vld [vmem:[%s4026_s29 + $0x28] sm:$0xff]  ;;  %v4073_v16 = vld [vmem:[%s4026_s29 + $0x60] sm:$0xff]  ;;  %3592 = vmatprep.mubr.msk.bf16.mxu1 %vm620_vm1, %v616_v9  ;;  %s5122_s3 = smov (!%p550_p9, %s3246_s3), 15  ;;  %s5124_s27 = smov (!%p569_p10, %s3251_s27), 15 }
  0x1d   : > { %5024 = vst [vmem:[#allocation12_spill] sm:$0xff] %v4064_v13  ;;  %5025 = vst [vmem:[#allocation13_spill] sm:$0xff] %v4070_v15  ;;  %v4076_v17 = vld [vmem:[%s4026_s29 + $0x68] sm:$0xff]  ;;  %3585 = vmatmul.mubr.msk.bf16.vlgmr.msra.gmra.mxu0 %vm620_vm1, %v613_v10  ;;  %v614_v18 = vpack.c.bf16 %v4070_v15, %v4064_v13  ;;  %v4086_v20 = vld [vmem:[%s4026_s29 + $0x30] sm:$0xff]  ;;  %s3247_s30 = sshll.u32 %s5122_s3, 1  ;;  %s3252_s15 = sshll.u32 %s5124_s27, 1 }
  0x1e   : > { %5026 = vst [vmem:[#allocation14_spill] sm:$0xff] %v4073_v16  ;;  %5027 = vst [vmem:[#allocation15_spill] sm:$0xff] %v4076_v17  ;;  %v618_v19 = vpack.c.bf16 %v4076_v17, %v4073_v16  ;;  %3593 = vmatmul.mubr.msk.bf16.vlgmr.msra.gmra.mxu1 %vm620_vm1, %v617_v14  ;;  %v4089_v21 = vld [vmem:[%s4026_s29 + $0x38] sm:$0xff]  ;;  %v4094_v22 = vld [vmem:[%s4026_s29 + $0x70] sm:$0xff]  ;;  %s554_s13 = sadd.s32 %s3247_s30, %s4020_s14  ;;  %s573_s17 = sadd.s32 %s3252_s15, %s4020_s14 }
  0x1f   : > { %5028 = vst [vmem:[#allocation16_spill] sm:$0xff] %v4086_v20  ;;  %5029 = vst [vmem:[#allocation17_spill] sm:$0xff] %v4089_v21  ;;  %3588 = vmatprep.mubr.msk.bf16.mxu0 %vm620_vm1, %v614_v18  ;;  %v4097_v23 = vld [vmem:[%s4026_s29 + $0x78] sm:$0xff]  ;;  %v615_v24 = vpack.c.bf16 %v4089_v21, %v4086_v20  ;;  %s3249_s16 = sshll.u32 %s554_s13, 3  ;;  %s3254_s28 = sshll.u32 %s573_s17, 3 }
  0x20   : > { %3596 = vmatprep.mubr.msk.bf16.mxu1 %vm620_vm1, %v618_v19  ;;  %5030 = vst [vmem:[#allocation18_spill] sm:$0xff] %v4094_v22  ;;  %5031 = vst [vmem:[#allocation19_spill] sm:$0xff] %v4097_v23  ;;  %v619_v25 = vpack.c.bf16 %v4097_v23, %v4094_v22  ;;  %s4108_s20 = scalar_lea.vmem %s4983_s1, %s3249_s16  ;;  %s4113_s3 = scalar_lea.vmem %s4984_s2, %s3254_s28 }
  0x21   : > { %828 = vst.msk [vmem:[#allocation2 + $0x8] sm:$0x2] %vm827_vm3, %v3903_v26  ;;  %829 = vst.msk [vmem:[#allocation2 + $0x14] sm:$0x2] %vm827_vm3, %v3903_v26 }
  0x22   : > { %830 = vst.msk [vmem:[#allocation2 + $0x20] sm:$0x2] %vm827_vm3, %v3903_v26  ;;  %831 = vst.msk [vmem:[#allocation2 + $0x2c] sm:$0x2] %vm827_vm3, %v3903_v26 }
  0x23   : > { %832 = vst.msk [vmem:[#allocation2 + $0x38] sm:$0x2] %vm827_vm3, %v3903_v26  ;;  %833 = vst.msk [vmem:[#allocation2 + $0x44] sm:$0x2] %vm827_vm3, %v3903_v26 }
  0x24   : > { %834 = vst.msk [vmem:[#allocation2 + $0x50] sm:$0x2] %vm827_vm3, %v3903_v26  ;;  %835 = vst.msk [vmem:[#allocation2 + $0x5c] sm:$0x2] %vm827_vm3, %v3903_v26 }
  0x25   : > { %3589 = vmatmul.mubr.msk.bf16.gmra.mxu0 %vm620_vm1, %v615_v24  ;;  %836 = vst.msk [vmem:[#allocation2 + $0x68] sm:$0x2] %vm827_vm3, %v3903_v26  ;;  %837 = vst.msk [vmem:[#allocation2 + $0x74] sm:$0x2] %vm827_vm3, %v3903_v26 }
  0x26   : > { %3597 = vmatmul.mubr.msk.bf16.gmra.mxu1 %vm620_vm1, %v619_v25  ;;  %838 = vst.msk [vmem:[#allocation2 + $0x80] sm:$0x2] %vm827_vm3, %v3903_v26  ;;  %839 = vst.msk [vmem:[#allocation2 + $0x8c] sm:$0x2] %vm827_vm3, %v3903_v26 }
  0x27   : > { %vm4171_vm8 = vmor %vm880_vm5, %vm881_vm6 }
  0xdd   : > { %v3586_v29 = vpop.f32.mrf.mxu0 }
  0xde   : > { %v754_v30 = vmul.f32 %v3586_v29, %v4144_v27  ;;  %v3594_v31 = vpop.f32.mrf.mxu1 }
  0xdf   : > { %v762_v32 = vmul.f32 %v3594_v31, %v4144_v27  ;;  %v683_v33 = vpop.f32.mrf.mxu0 }
  0xe0   : > { %v776_v34 = vadd.f32 %v4149_v28, %v754_v30  ;;  %v752_v35 = vmul.f32 %v4144_v27, %v683_v33  ;;  %v715_v36 = vpop.f32.mrf.mxu1 }
  0xe1   : > { %v784_v37 = vadd.f32 %v4149_v28, %v762_v32  ;;  %v760_v38 = vmul.f32 %v4144_v27, %v715_v36  ;;  %v3587_v39 = vpop.f32.mrf.mxu0 }
  0xe2   : > { %v792_v40 = vmax.f32 %v776_v34, 0.0  ;;  %v774_v41 = vadd.f32 %v4149_v28, %v752_v35  ;;  %v755_v42 = vmul.f32 %v3587_v39, %v4144_v27  ;;  %v3595_v43 = vpop.f32.mrf.mxu1 }
  0xe3   : > { %v800_v44 = vmax.f32 %v784_v37, 0.0  ;;  %v782_v45 = vadd.f32 %v4149_v28, %v760_v38  ;;  %v763_v46 = vmul.f32 %v3595_v43, %v4144_v27  ;;  %v686_v47 = vpop.f32.mrf.mxu0 }
  0xe4   : > { %v3455_v48 = vpack.c.bf16 %v792_v40, %v792_v40  ;;  %v790_v49 = vmax.f32 %v774_v41, 0.0  ;;  %v777_v50 = vadd.f32 %v4149_v28, %v755_v42  ;;  %v753_v51 = vmul.f32 %v4144_v27, %v686_v47  ;;  %v718_v52 = vpop.f32.mrf.mxu1 }
  0xe5   : > { %v3463_v53 = vpack.c.bf16 %v800_v44, %v800_v44  ;;  %v798_v54 = vmax.f32 %v782_v45, 0.0  ;;  %v785_v55 = vadd.f32 %v4149_v28, %v763_v46  ;;  %v761_v56 = vmul.f32 %v4144_v27, %v718_v52  ;;  %v3590_v57 = vpop.f32.mrf.mxu0 }
  0xe6   : > { %v888_v58 = vrot.slane %v3455_v48, 7  ;;  %v3453_v59 = vpack.c.bf16 %v790_v49, %v790_v49  ;;  %v793_v60 = vmax.f32 %v777_v50, 0.0  ;;  %v775_v61 = vadd.f32 %v4149_v28, %v753_v51  ;;  %v3598_v62 = vpop.f32.mrf.mxu1 }
  0xe7   : > { %v908_v63 = vrot.slane %v3463_v53, 7  ;;  %v3461_v5 = vpack.c.bf16 %v798_v54, %v798_v54  ;;  %v801_v9 = vmax.f32 %v785_v55, 0.0  ;;  %v783_v10 = vadd.f32 %v4149_v28, %v761_v56  ;;  %v699_v14 = vpop.f32.mrf.mxu0 }
  0xe8   : > { %v889_v18 = vrot.slane %v888_v58, 4  ;;  %953 = vst.msk [vmem:[#allocation2 + $0x24] sm:$0xe] %vm948_vm4, %v888_v58  ;;  %v883_v19 = vrot.slane %v3453_v59, 7  ;;  %v3456_v24 = vpack.c.bf16 %v793_v60, %v793_v60  ;;  %v791_v25 = vmax.f32 %v775_v61, 0.0  ;;  %v731_v26 = vpop.f32.mrf.mxu1 }
  0xe9   : > { %v909_v29 = vrot.slane %v908_v63, 4  ;;  %965 = vst.msk [vmem:[#allocation2 + $0x54] sm:$0xe] %vm948_vm4, %v908_v63  ;;  %v903_v30 = vrot.slane %v3461_v5, 7  ;;  %v3464_v32 = vpack.c.bf16 %v801_v9, %v801_v9  ;;  %v799_v33 = vmax.f32 %v783_v10, 0.0  ;;  %v3591_v38 = vpop.f32.mrf.mxu0 }
  0xea   : > { %v884_v34 = vrot.slane %v883_v19, 4  ;;  %949 = vst.msk [vmem:[#allocation2 + $0x18] sm:$0xe] %vm948_vm4, %v883_v19  ;;  %v890_v35 = vrot.slane %v3456_v24, 7  ;;  %v3454_v36 = vpack.c.bf16 %v791_v25, %v791_v25  ;;  %v758_v37 = vmul.f32 %v3590_v57, %v4144_v27  ;;  %v3599_v39 = vpop.f32.mrf.mxu1 }
  0xeb   : > { %v904_v40 = vrot.slane %v903_v30, 4  ;;  %962 = vst.msk [vmem:[#allocation2 + $0x48] sm:$0xe] %vm948_vm4, %v903_v30  ;;  %v910_v41 = vrot.slane %v3464_v32, 7  ;;  %v3462_v42 = vpack.c.bf16 %v799_v33, %v799_v33  ;;  %v766_v43 = vmul.f32 %v3598_v62, %v4144_v27  ;;  %v702_v56 = vpop.f32.mrf.mxu0 }
  0xec   : > { %v891_v44 = vsel %vm4171_vm8, %v889_v18, %v890_v35  ;;  %v892_v45 = vrot.slane %v890_v35, 4  ;;  %v885_v46 = vrot.slane %v3454_v36, 7  ;;  %v780_v47 = vadd.f32 %v4149_v28, %v758_v37  ;;  %v734_v57 = vpop.f32.mrf.mxu1 }
  0xed   : > { %954 = vst.msk [vmem:[#allocation2 + $0x28] sm:$0xf] %vm950_vm7, %v891_v44  ;;  %v911_v48 = vsel %vm4171_vm8, %v909_v29, %v910_v41  ;;  %v912_v49 = vrot.slane %v910_v41, 4  ;;  %v905_v50 = vrot.slane %v3462_v42, 7  ;;  %v788_v51 = vadd.f32 %v4149_v28, %v766_v43 }
  0xee   : > { %955 = vst.msk [vmem:[#allocation2 + $0x2c] sm:$0x1] %vm814_vm2, %v892_v45  ;;  %v886_v52 = vsel %vm4171_vm8, %v884_v34, %v885_v46  ;;  %v887_v53 = vrot.slane %v885_v46, 4  ;;  %v796_v54 = vmax.f32 %v780_v47, 0.0  ;;  %v756_v55 = vmul.f32 %v4144_v27, %v699_v14 }
  0xef   : > { %966 = vst.msk [vmem:[#allocation2 + $0x58] sm:$0xf] %vm950_vm7, %v911_v48  ;;  %951 = vst.msk [vmem:[#allocation2 + $0x1c] sm:$0xf] %vm950_vm7, %v886_v52  ;;  %v906_v58 = vsel %vm4171_vm8, %v904_v40, %v905_v50  ;;  %v907_v59 = vrot.slane %v905_v50, 4  ;;  %v804_v60 = vmax.f32 %v788_v51, 0.0  ;;  %v764_v61 = vmul.f32 %v4144_v27, %v731_v26 }
  0xf0   : > { %967 = vst.msk [vmem:[#allocation2 + $0x5c] sm:$0x1] %vm814_vm2, %v912_v49  ;;  %952 = vst.msk [vmem:[#allocation2 + $0x20] sm:$0x1] %vm814_vm2, %v887_v53  ;;  %v3459_v62 = vpack.c.bf16 %v796_v54, %v796_v54  ;;  %v778_v63 = vadd.f32 %v4149_v28, %v756_v55  ;;  %v759_v5 = vmul.f32 %v3591_v38, %v4144_v27 }
  0xf1   : > { %963 = vst.msk [vmem:[#allocation2 + $0x4c] sm:$0xf] %vm950_vm7, %v906_v58  ;;  %v767_v9 = vmul.f32 %v3599_v39, %v4144_v27  ;;  %v3467_v10 = vpack.c.bf16 %v804_v60, %v804_v60  ;;  %v786_v14 = vadd.f32 %v4149_v28, %v764_v61  ;;  %v757_v18 = vmul.f32 %v4144_v27, %v702_v56 }
  0xf2   : > { %964 = vst.msk [vmem:[#allocation2 + $0x50] sm:$0x1] %vm814_vm2, %v907_v59  ;;  %v765_v19 = vmul.f32 %v4144_v27, %v734_v57  ;;  %v898_v24 = vrot.slane %v3459_v62, 7  ;;  %v794_v25 = vmax.f32 %v778_v63, 0.0  ;;  %v781_v26 = vadd.f32 %v4149_v28, %v759_v5 }
  0xf3   : > { %v789_v29 = vadd.f32 %v4149_v28, %v767_v9  ;;  %v918_v30 = vrot.slane %v3467_v10, 7  ;;  %v802_v32 = vmax.f32 %v786_v14, 0.0  ;;  %v779_v33 = vadd.f32 %v4149_v28, %v757_v18 }
  0xf4   : > { %v787_v34 = vadd.f32 %v4149_v28, %v765_v19  ;;  %959 = vst.msk [vmem:[#allocation2 + $0x3c] sm:$0xe] %vm948_vm4, %v898_v24  ;;  %v3457_v35 = vpack.c.bf16 %v794_v25, %v794_v25  ;;  %v797_v36 = vmax.f32 %v781_v26, 0.0  ;;  %v899_v47 = vrot.slane %v898_v24, 4 }
  0xf5   : > { %v805_v37 = vmax.f32 %v789_v29, 0.0  ;;  %971 = vst.msk [vmem:[#allocation2 + $0x6c] sm:$0xe] %vm948_vm4, %v918_v30  ;;  %v3465_v38 = vpack.c.bf16 %v802_v32, %v802_v32  ;;  %v795_v39 = vmax.f32 %v779_v33, 0.0  ;;  %v919_v48 = vrot.slane %v918_v30, 4 }
  0xf6   : > { %v803_v40 = vmax.f32 %v787_v34, 0.0  ;;  %v893_v41 = vrot.slane %v3457_v35, 7  ;;  %v3460_v42 = vpack.c.bf16 %v797_v36, %v797_v36 }
  0xf7   : > { %v3468_v43 = vpack.c.bf16 %v805_v37, %v805_v37  ;;  %v913_v44 = vrot.slane %v3465_v38, 7  ;;  %v3458_v45 = vpack.c.bf16 %v795_v39, %v795_v39 }
  0xf8   : > { %v3466_v46 = vpack.c.bf16 %v803_v40, %v803_v40  ;;  %956 = vst.msk [vmem:[#allocation2 + $0x30] sm:$0xe] %vm948_vm4, %v893_v41  ;;  %v900_v49 = vrot.slane %v3460_v42, 7  ;;  %v894_v51 = vrot.slane %v893_v41, 4 }
  0xf9   : > { %v920_v50 = vrot.slane %v3468_v43, 7  ;;  %v914_v52 = vrot.slane %v913_v44, 4  ;;  %968 = vst.msk [vmem:[#allocation2 + $0x60] sm:$0xe] %vm948_vm4, %v913_v44  ;;  %v895_v53 = vrot.slane %v3458_v45, 7 }
  0xfa   : > { %v915_v54 = vrot.slane %v3466_v46, 7  ;;  %v901_v55 = vsel %vm4171_vm8, %v899_v47, %v900_v49  ;;  %v902_v56 = vrot.slane %v900_v49, 4 }
  0xfb   : > { %v921_v57 = vsel %vm4171_vm8, %v919_v48, %v920_v50  ;;  %v922_v58 = vrot.slane %v920_v50, 4  ;;  %960 = vst.msk [vmem:[#allocation2 + $0x40] sm:$0xf] %vm950_vm7, %v901_v55  ;;  %v896_v59 = vsel %vm4171_vm8, %v894_v51, %v895_v53  ;;  %v897_v60 = vrot.slane %v895_v53, 4  ;;  %977 = sbr.rel (%p3285_p11) target bundleno = 472 (0x1d8), region = 72 }
  0xfc   : > { %972 = vst.msk [vmem:[#allocation2 + $0x70] sm:$0xf] %vm950_vm7, %v921_v57  ;;  %v916_v61 = vsel %vm4171_vm8, %v914_v52, %v915_v54  ;;  %v917_v62 = vrot.slane %v915_v54, 4  ;;  %957 = vst.msk [vmem:[#allocation2 + $0x34] sm:$0xf] %vm950_vm7, %v896_v59 }
  0xfd   : > { %961 = vst.msk [vmem:[#allocation2 + $0x44] sm:$0x1] %vm814_vm2, %v902_v56  ;;  %973 = vst.msk [vmem:[#allocation2 + $0x74] sm:$0x1] %vm814_vm2, %v922_v58 }
  0xfe   : > { %969 = vst.msk [vmem:[#allocation2 + $0x64] sm:$0xf] %vm950_vm7, %v916_v61 }
  0xff   : > { %958 = vst.msk [vmem:[#allocation2 + $0x38] sm:$0x1] %vm814_vm2, %v897_v60  ;;  %970 = vst.msk [vmem:[#allocation2 + $0x68] sm:$0x1] %vm814_vm2, %v917_v62 }
 0x100   : > { %3796 = vmatprep.subr.msk.bf16.mxu0 %vm645_vm0, %v4006_v0  ;;  %v978_v63 = vld [vmem:[%s4108_s20] sm:$0xff]  ;;  %v979_v5 = vld [vmem:[%s4108_s20 + $0x8] sm:$0xff]  ;;  %v980_v9 = vld [vmem:[%s4108_s20 + $0x10] sm:$0xff] }
 0x101   : > { %3601 = vmatpush3.bf16.msra.mxu0 %v4015_v1  ;;  %v982_v10 = vpack.c.bf16 %v979_v5, %v978_v63  ;;  %v981_v14 = vld [vmem:[%s4108_s20 + $0x18] sm:$0xff] }
 0x102   : > { %v983_v18 = vpack.c.bf16 %v981_v14, %v980_v9 }
 0x103   : > { %3602 = vmatprep.mubr.msk.bf16.mxu0 %vm620_vm1, %v982_v10 }
 0x104   : > { %3603 = vmatmul.mubr.msk.bf16.vlgmr.msra.gmra.mxu0 %vm620_vm1, %v983_v18 }
 0x1c4   : > { %v3604_v19 = vpop.f32.mrf.mxu0 }
 0x1c5   : > { %v1041_v24 = vmul.f32 %v3604_v19, %v4144_v27 }
 0x1c6   : > { %v1024_v25 = vpop.f32.mrf.mxu0 }
 0x1c7   : > { %v1045_v26 = vadd.f32 %v4149_v28, %v1041_v24  ;;  %v1039_v29 = vmul.f32 %v4144_v27, %v1024_v25 }
 0x1c8   : > { %v3605_v30 = vpop.f32.mrf.mxu0 }
 0x1c9   : > { %v1049_v32 = vmax.f32 %v1045_v26, 0.0  ;;  %v1043_v33 = vadd.f32 %v4149_v28, %v1039_v29  ;;  %v1042_v34 = vmul.f32 %v3605_v30, %v4144_v27 }
 0x1ca   : > { %v1027_v35 = vpop.f32.mrf.mxu0 }
 0x1cb   : > { %v3471_v36 = vpack.c.bf16 %v1049_v32, %v1049_v32  ;;  %v1047_v37 = vmax.f32 %v1043_v33, 0.0  ;;  %v1046_v38 = vadd.f32 %v4149_v28, %v1042_v34  ;;  %v1040_v39 = vmul.f32 %v4144_v27, %v1027_v35 }
 0x1cd   : > { %v1068_v40 = vrot.slane %v3471_v36, 7  ;;  %v3469_v41 = vpack.c.bf16 %v1047_v37, %v1047_v37  ;;  %v1050_v42 = vmax.f32 %v1046_v38, 0.0  ;;  %v1044_v43 = vadd.f32 %v4149_v28, %v1040_v39 }
 0x1cf   : > { %1082 = vst.msk [vmem:[#allocation2 + $0xc] sm:$0xe] %vm948_vm4, %v1068_v40  ;;  %v1063_v44 = vrot.slane %v3469_v41, 7  ;;  %v3472_v45 = vpack.c.bf16 %v1050_v42, %v1050_v42  ;;  %v1048_v46 = vmax.f32 %v1044_v43, 0.0  ;;  %v1069_v47 = vrot.slane %v1068_v40, 4 }
 0x1d1   : > { %1079 = vst.msk [vmem:[#allocation2] sm:$0xe] %vm948_vm4, %v1063_v44  ;;  %v1070_v48 = vrot.slane %v3472_v45, 7  ;;  %v3470_v49 = vpack.c.bf16 %v1048_v46, %v1048_v46  ;;  %v1064_v50 = vrot.slane %v1063_v44, 4 }
 0x1d3   : > { %v1071_v51 = vsel %vm4171_vm8, %v1069_v47, %v1070_v48  ;;  %v1072_v52 = vrot.slane %v1070_v48, 4  ;;  %v1065_v53 = vrot.slane %v3470_v49, 7 }
 0x1d4   : > { %1083 = vst.msk [vmem:[#allocation2 + $0x10] sm:$0xf] %vm950_vm7, %v1071_v51 }
 0x1d5   : > { %1084 = vst.msk [vmem:[#allocation2 + $0x14] sm:$0x1] %vm814_vm2, %v1072_v52  ;;  %v1066_v54 = vsel %vm4171_vm8, %v1064_v50, %v1065_v53  ;;  %v1067_v55 = vrot.slane %v1065_v53, 4 }
 0x1d6   : > { %1080 = vst.msk [vmem:[#allocation2 + $0x4] sm:$0xf] %vm950_vm7, %v1066_v54 }
 0x1d7   : > { %1081 = vst.msk [vmem:[#allocation2 + $0x8] sm:$0x1] %vm814_vm2, %v1067_v55 }
 0x1d8 PF: > { %p3292_p12 = scmp.ne.s32.totalorder %s3885_s21, 0 }
 0x1da   : > { %1088 = sbr.rel (%p3292_p12) target bundleno = 483 (0x1e3), region = 76 }
 0x1df   : > { %v3904_v56 = vmov 0  }
 0x1e0   : > { %1089 = vst.msk [vmem:[#allocation2] sm:$0xe] %vm948_vm4, %v3904_v56  ;;  %1092 = vst.msk [vmem:[#allocation2 + $0xc] sm:$0xe] %vm948_vm4, %v3904_v56 }
 0x1e1   : > { %1090 = vst.msk [vmem:[#allocation2 + $0x4] sm:$0xf] %vm950_vm7, %v3904_v56  ;;  %1093 = vst.msk [vmem:[#allocation2 + $0x10] sm:$0xf] %vm950_vm7, %v3904_v56 }
 0x1e2   : > { %1091 = vst.msk [vmem:[#allocation2 + $0x8] sm:$0x1] %vm814_vm2, %v3904_v56  ;;  %1094 = vst.msk [vmem:[#allocation2 + $0x14] sm:$0x1] %vm814_vm2, %v3904_v56 }
 0x1e3 PF: > { %p3293_p13 = scmp.ge.s32.totalorder %s3885_s21, 1 }
 0x1e5   : > { %1098 = sbr.rel (%p3293_p13) target bundleno = 706 (0x2c2), region = 80 }
 0x1ea   : > { %3797 = vmatprep.subr.msk.bf16.mxu0 %vm645_vm0, %v4006_v0  ;;  %v1099_v57 = vld [vmem:[%s4113_s3] sm:$0xff]  ;;  %v1100_v58 = vld [vmem:[%s4113_s3 + $0x8] sm:$0xff]  ;;  %v1101_v59 = vld [vmem:[%s4113_s3 + $0x10] sm:$0xff] }
 0x1eb   : > { %3607 = vmatpush3.bf16.msra.mxu0 %v4015_v1  ;;  %v1103_v60 = vpack.c.bf16 %v1100_v58, %v1099_v57  ;;  %v1102_v61 = vld [vmem:[%s4113_s3 + $0x18] sm:$0xff] }
 0x1ec   : > { %v1104_v62 = vpack.c.bf16 %v1102_v61, %v1101_v59 }
 0x1ed   : > { %3608 = vmatprep.mubr.msk.bf16.mxu0 %vm620_vm1, %v1103_v60 }
 0x1ee   : > { %3609 = vmatmul.mubr.msk.bf16.vlgmr.msra.gmra.mxu0 %vm620_vm1, %v1104_v62 }
 0x2ae   : > { %v3610_v63 = vpop.f32.mrf.mxu0 }
 0x2af   : > { %v1162_v5 = vmul.f32 %v3610_v63, %v4144_v27 }
 0x2b0   : > { %v1145_v9 = vpop.f32.mrf.mxu0 }
 0x2b1   : > { %v1166_v10 = vadd.f32 %v4149_v28, %v1162_v5  ;;  %v1160_v0 = vmul.f32 %v4144_v27, %v1145_v9 }
 0x2b2   : > { %v3611_v14 = vpop.f32.mrf.mxu0 }
 0x2b3   : > { %v1170_v18 = vmax.f32 %v1166_v10, 0.0  ;;  %v1164_v19 = vadd.f32 %v4149_v28, %v1160_v0  ;;  %v1163_v1 = vmul.f32 %v3611_v14, %v4144_v27 }
 0x2b4   : > { %v1148_v24 = vpop.f32.mrf.mxu0 }
 0x2b5   : > { %v3475_v25 = vpack.c.bf16 %v1170_v18, %v1170_v18  ;;  %v1168_v26 = vmax.f32 %v1164_v19, 0.0  ;;  %v1167_v29 = vadd.f32 %v4149_v28, %v1163_v1  ;;  %v1161_v30 = vmul.f32 %v4144_v27, %v1148_v24 }
 0x2b7   : > { %v1189_v32 = vrot.slane %v3475_v25, 7  ;;  %v3473_v33 = vpack.c.bf16 %v1168_v26, %v1168_v26  ;;  %v1171_v34 = vmax.f32 %v1167_v29, 0.0  ;;  %v1165_v35 = vadd.f32 %v4149_v28, %v1161_v30 }
 0x2b9   : > { %1204 = vst.msk [vmem:[#allocation2 + $0x84] sm:$0xe] %vm948_vm4, %v1189_v32  ;;  %v1184_v36 = vrot.slane %v3473_v33, 7  ;;  %v3476_v37 = vpack.c.bf16 %v1171_v34, %v1171_v34  ;;  %v1169_v38 = vmax.f32 %v1165_v35, 0.0  ;;  %v1190_v39 = vrot.slane %v1189_v32, 4 }
 0x2bb   : > { %1201 = vst.msk [vmem:[#allocation2 + $0x78] sm:$0xe] %vm948_vm4, %v1184_v36  ;;  %v1191_v40 = vrot.slane %v3476_v37, 7  ;;  %v3474_v41 = vpack.c.bf16 %v1169_v38, %v1169_v38  ;;  %v1185_v42 = vrot.slane %v1184_v36, 4 }
 0x2bd   : > { %v1192_v43 = vsel %vm4171_vm8, %v1190_v39, %v1191_v40  ;;  %v1193_v27 = vrot.slane %v1191_v40, 4  ;;  %v1186_v44 = vrot.slane %v3474_v41, 7 }
 0x2be   : > { %1205 = vst.msk [vmem:[#allocation2 + $0x88] sm:$0xf] %vm950_vm7, %v1192_v43 }
 0x2bf   : > { %1206 = vst.msk [vmem:[#allocation2 + $0x8c] sm:$0x1] %vm814_vm2, %v1193_v27  ;;  %v1187_v28 = vsel %vm4171_vm8, %v1185_v42, %v1186_v44  ;;  %v1188_v45 = vrot.slane %v1186_v44, 4 }
 0x2c0   : > { %1202 = vst.msk [vmem:[#allocation2 + $0x7c] sm:$0xf] %vm950_vm7, %v1187_v28 }
 0x2c1   : > { %1203 = vst.msk [vmem:[#allocation2 + $0x80] sm:$0x1] %vm814_vm2, %v1188_v45 }
 0x2c2 PF: > { %p3300_p0 = scmp.ne.s32.totalorder %s3885_s21, 1 }
 0x2c4   : > { %1210 = sbr.rel (%p3300_p0) target bundleno = 717 (0x2cd), region = 84 }
 0x2c9   : > { %v3905_v46 = vmov 0  }
 0x2ca   : > { %1212 = vst.msk [vmem:[#allocation2 + $0x78] sm:$0xe] %vm948_vm4, %v3905_v46  ;;  %1215 = vst.msk [vmem:[#allocation2 + $0x84] sm:$0xe] %vm948_vm4, %v3905_v46 }
 0x2cb   : > { %1213 = vst.msk [vmem:[#allocation2 + $0x7c] sm:$0xf] %vm950_vm7, %v3905_v46  ;;  %1216 = vst.msk [vmem:[#allocation2 + $0x88] sm:$0xf] %vm950_vm7, %v3905_v46 }
 0x2cc   : > { %1214 = vst.msk [vmem:[#allocation2 + $0x80] sm:$0x1] %vm814_vm2, %v3905_v46  ;;  %1217 = vst.msk [vmem:[#allocation2 + $0x8c] sm:$0x1] %vm814_vm2, %v3905_v46 }
 0x2cd PF: > { %v1221_v31 = vld [vmem:[%s4988_s6 + $0x6] sm:$0x3]  ;;  %vm1316_vm9 = vcmask 1041408   ;;  %v1218_v47 = vld [vmem:[%s4988_s6] sm:$0x3]  ;;  %v3851_v48 = vld [vmem:[#allocation2 + $0x18] sm:$0xff]  }
 0x2ce   : > { %3798 = vmatprep.subr.msk.bf16.mxu0 %vm1316_vm9, %v1221_v31  ;;  %3799 = vmatprep.subr.msk.bf16.mxu1 %vm1316_vm9, %v1218_v47  ;;  %v1318_v49 = vsel %vm1316_vm9, %v1221_v31, 0  ;;  %v1434_v50 = vsel %vm1316_vm9, %v1218_v47, 0  ;;  %vm1291_vm10 = vcmask 31744   ;;  %v3852_v51 = vld [vmem:[#allocation2] sm:$0xff]   ;;  %v3854_v53 = vld [vmem:[#allocation2 + $0xc] sm:$0xff]   ;;  %v4342_v5 = vld [vmem:[#allocation2 + $0x54] sm:$0xff]  }
 0x2cf   : > { %3613 = vmatpush3.bf16.msra.mxu0 %v1318_v49  ;;  %3631 = vmatpush3.bf16.msra.mxu1 %v1434_v50  ;;  %v3853_v52 = vld [vmem:[#allocation2 + $0x24] sm:$0xff]   ;;  %v1224_v54 = vld [vmem:[%s4988_s6 + $0xc] sm:$0x3]  ;;  %v3855_v56 = vld [vmem:[#allocation2 + $0x30] sm:$0xff]   ;;  %vm1725_vm11 = vcmask 1042432   ;;  %vm1726_vm12 = vcmask 1046532  }
 0x2d0   : > { %3614 = vmatprep.mubr.msk.bf16.mxu0 %vm1291_vm10, %v3851_v48  ;;  %3632 = vmatprep.mubr.msk.bf16.mxu1 %vm1291_vm10, %v3852_v51  ;;  %v1550_v55 = vsel %vm1316_vm9, %v1224_v54, 0  ;;  %v4320_v57 = vld [vmem:[#allocation2 + $0x3c] sm:$0xff]   ;;  %v4322_v58 = vld [vmem:[#allocation2 + $0x48] sm:$0xff]   ;;  %v4335_v62 = vld [vmem:[#allocation2 + $0x4] sm:$0xf]  ;;  %vm2285_vm14 = vcmask 1045508  }
 0x2d1   : > { %3800 = vmatprep.subr.msk.bf16.mxu0 %vm1316_vm9, %v1224_v54  ;;  %v1219_v59 = vld [vmem:[%s4988_s6 + $0x2] sm:$0x3]  ;;  %v1222_v60 = vld [vmem:[%s4988_s6 + $0x8] sm:$0x3]  ;;  %v1730_v63 = vrot.slane %v4335_v62, 5  ;;  %vm4350_vm13 = vmor %vm1725_vm11, %vm1726_vm12 }
 0x2d2   : > { %3615 = vmatmul.mubr.msk.bf16.vlgmr.msra.gmra.mxu0 %vm1291_vm10, %v3853_v52  ;;  %3633 = vmatmul.mubr.msk.bf16.vlgmr.msra.gmra.mxu1 %vm1291_vm10, %v3854_v53  ;;  %v1833_v61 = vsel %vm1316_vm9, %v1219_v59, 0  ;;  %v1665_v9 = vld [vmem:[#allocation2] sm:$0xe]  ;;  %v1667_v10 = vld [vmem:[#allocation2 + $0x8] sm:$0x1]  ;;  %v4368_v35 = vld [vmem:[#allocation2 + $0x6c] sm:$0xff]  }
 0x2d3   : > { %3649 = vmatpush3.bf16.msra.mxu0 %v1550_v55  ;;  %3636 = vmatprep.mubr.msk.bf16.mxu1 %vm1291_vm10, %v3851_v48  ;;  %v4344_v0 = vld [vmem:[#allocation2 + $0x60] sm:$0xff]   ;;  %v3337_v14 = vrot.slane %v1665_v9, 9  ;;  %v1732_v18 = vrot.slane %v1730_v63, 4  ;;  %v1733_v19 = vrot.slane %v1667_v10, 5  ;;  %v4346_v1 = vld [vmem:[#allocation2 + $0x10] sm:$0xf]  ;;  %vm4510_vm15 = vmor %vm1316_vm9, %vm2285_vm14 }
 0x2d4   : > { %3618 = vmatprep.mubr.msk.bf16.mxu0 %vm1291_vm10, %v3855_v56  ;;  %3801 = vmatprep.subr.msk.bf16.mxu1 %vm1316_vm9, %v1219_v59  ;;  %v4354_v25 = vld [vmem:[#allocation2 + $0x1c] sm:$0xf]  ;;  %v1668_v26 = vld [vmem:[#allocation2 + $0xc] sm:$0xe]  ;;  %v1737_v29 = vrot.slane %v4346_v1, 5  ;;  %v1981_v55 = vsel %vm1316_vm9, %v1222_v60, 0 }
 0x2d5   : > { %3802 = vmatprep.subr.msk.bf16.mxu0 %vm1316_vm9, %v1222_v60  ;;  %3667 = vmatpush3.bf16.msra.mxu1 %v1833_v61  ;;  %v1731_v30 = vsel %vm4350_vm13, %v3337_v14, %v1730_v63  ;;  %v1734_v32 = vsel %vm4350_vm13, %v1732_v18, %v1733_v19  ;;  %v1670_v33 = vld [vmem:[#allocation2 + $0x14] sm:$0x1]  ;;  %v1744_v34 = vrot.slane %v4354_v25, 5  ;;  %v1671_v36 = vld [vmem:[#allocation2 + $0x18] sm:$0xe]  ;;  %v3338_v39 = vrot.slane %v1668_v26, 9 }
 0x2d6   : > { %v1673_v37 = vld [vmem:[#allocation2 + $0x20] sm:$0x1]  ;;  %v3345_v38 = vcombine.low %v1731_v30, %v1734_v32  ;;  %v1739_v40 = vrot.slane %v1737_v29, 4  ;;  %v1740_v41 = vrot.slane %v1670_v33, 5  ;;  %v1225_v42 = vld [vmem:[%s4988_s6 + $0xe] sm:$0x3] }
 0x2d7   : > { %v3339_v43 = vrot.slane %v1671_v36, 9  ;;  %v1746_v27 = vrot.slane %v1744_v34, 4  ;;  %v1747_v44 = vrot.slane %v1673_v37, 5  ;;  %v4373_v28 = vld [vmem:[#allocation2 + $0x28] sm:$0xf]  ;;  %3803 = vmatprep.subr.msk.bf16.mxu1 %vm1316_vm9, %v1225_v42  ;;  %v1738_v46 = vsel %vm4350_vm13, %v3338_v39, %v1737_v29 }
 0x2d8   : > { %v4378_v45 = vld [vmem:[#allocation2 + $0x34] sm:$0xf]  ;;  %v1741_v31 = vsel %vm4350_vm13, %v1739_v40, %v1740_v41  ;;  %v1751_v47 = vrot.slane %v4373_v28, 5  ;;  %v1674_v50 = vld [vmem:[#allocation2 + $0x24] sm:$0xe]  ;;  %v2129_v29 = vsel %vm1316_vm9, %v1225_v42, 0 }
 0x2d9   : > { %v1745_v48 = vsel %vm4350_vm13, %v3339_v43, %v1744_v34  ;;  %v1748_v49 = vsel %vm4350_vm13, %v1746_v27, %v1747_v44  ;;  %v1676_v51 = vld [vmem:[#allocation2 + $0x2c] sm:$0x1]  ;;  %v1677_v53 = vld [vmem:[#allocation2 + $0x30] sm:$0xe]  ;;  %v1679_v54 = vld [vmem:[#allocation2 + $0x38] sm:$0x1] }
 0x2da   : > { %3619 = vmatmul.mubr.msk.bf16.gmra.mxu0 %vm1291_vm10, %v4320_v57  ;;  %3637 = vmatmul.mubr.msk.bf16.gmra.mxu1 %vm1291_vm10, %v3853_v52  ;;  %v1758_v52 = vrot.slane %v4378_v45, 5  ;;  %v4395_v59 = vcombine.low %v1745_v48, %v1748_v49  ;;  %v3340_v61 = vrot.slane %v1674_v50, 9  ;;  %v1753_v63 = vrot.slane %v1751_v47, 4  ;;  %v4397_v19 = vld [vmem:[#allocation2 + $0x40] sm:$0xf] }
 0x2db   : > { %3622 = vmatprep.mubr.msk.bf16.mxu0 %vm1291_vm10, %v4322_v58  ;;  %3640 = vmatprep.mubr.msk.bf16.mxu1 %vm1291_vm10, %v3855_v56  ;;  %v1754_v9 = vrot.slane %v1676_v51, 5  ;;  %v3341_v10 = vrot.slane %v1677_v53, 9  ;;  %v1761_v18 = vrot.slane %v1679_v54, 5  ;;  %v4401_v26 = vld [vmem:[#allocation2 + $0x4c] sm:$0xf]  ;;  %v1765_v33 = vrot.slane %v4397_v19, 5 }
 0x2dc   : > { %v1760_v14 = vrot.slane %v1758_v52, 4  ;;  %v1220_v60 = vld [vmem:[%s4988_s6 + $0x4] sm:$0x3]  ;;  %v4411_v30 = vld [vmem:[%s4988_s6 + $0xa] sm:$0x3] }
 0x2dd   : > { %v1755_v32 = vsel %vm4350_vm13, %v1753_v63, %v1754_v9  ;;  %v1759_v34 = vsel %vm4350_vm13, %v3341_v10, %v1758_v52  ;;  %v1680_v37 = vld [vmem:[#allocation2 + $0x3c] sm:$0xe]  ;;  %v1683_v39 = vld [vmem:[#allocation2 + $0x48] sm:$0xe]  ;;  %v1685_v40 = vld [vmem:[#allocation2 + $0x50] sm:$0x1] }
 0x2de   : > { %v1762_v36 = vsel %vm4350_vm13, %v1760_v14, %v1761_v18  ;;  %v3342_v43 = vrot.slane %v1680_v37, 9  ;;  %v1767_v27 = vrot.slane %v1765_v33, 4  ;;  %v4430_v48 = vld [vmem:[#allocation2 + $0x58] sm:$0xf]  ;;  %v1686_v53 = vld [vmem:[#allocation2 + $0x54] sm:$0xe] }
 0x2df   : > { %v3349_v42 = vcombine.low %v1759_v34, %v1762_v36  ;;  %v1779_v51 = vrot.slane %v4430_v48, 5  ;;  %v1688_v54 = vld [vmem:[#allocation2 + $0x5c] sm:$0x1]  ;;  %v3862_v18 = vld [vmem:[#allocation2 + $0x84] sm:$0xff]   ;;  %v2392_v34 = vsel %vm1316_vm9, %v1220_v60, 0 }
 0x2e0   : > { %v1766_v49 = vsel %vm4350_vm13, %v3342_v43, %v1765_v33  ;;  %v1782_v9 = vrot.slane %v1688_v54, 5  ;;  %v1691_v33 = vld [vmem:[#allocation2 + $0x68] sm:$0x1]  ;;  %v1692_v43 = vld [vmem:[#allocation2 + $0x6c] sm:$0xe]  ;;  %v2289_v54 = vrot.slane %v4335_v62, 6 }
 0x2e1   : > { %v1781_v63 = vrot.slane %v1779_v51, 4  ;;  %v2245_v62 = vld [vmem:[#allocation2 + $0x8] sm:$0x3]  ;;  %v2252_v24 = vld [vmem:[#allocation2 + $0x30] sm:$0xc] }
 0x2e2   : > { %3623 = vmatmul.mubr.msk.bf16.gmra.mxu0 %vm1291_vm10, %v4342_v5  ;;  %3641 = vmatmul.mubr.msk.bf16.gmra.mxu1 %vm1291_vm10, %v4320_v57 }
 0x2e3   : > { %3626 = vmatprep.mubr.msk.bf16.mxu0 %vm1291_vm10, %v4344_v0  ;;  %3644 = vmatprep.mubr.msk.bf16.mxu1 %vm1291_vm10, %v4322_v58  ;;  %v1783_v14 = vsel %vm4350_vm13, %v1781_v63, %v1782_v9  ;;  %v1698_v63 = vld [vmem:[#allocation2 + $0x84] sm:$0xe]  ;;  %v1700_v9 = vld [vmem:[#allocation2 + $0x8c] sm:$0x1] }
 0x2ea   : > { %3627 = vmatmul.mubr.msk.bf16.gmra.mxu0 %vm1291_vm10, %v4368_v35  ;;  %3645 = vmatmul.mubr.msk.bf16.gmra.mxu1 %vm1291_vm10, %v4342_v5 }
 0x2eb   : > { %3650 = vmatprep.mubr.msk.bf16.mxu0 %vm1291_vm10, %v3855_v56  ;;  %3668 = vmatprep.mubr.msk.bf16.mxu1 %vm1291_vm10, %v3345_v38  ;;  %v3346_v56 = vcombine.low %v1738_v46, %v1741_v31  ;;  %v1682_v38 = vld [vmem:[#allocation2 + $0x44] sm:$0x1]  ;;  %v3343_v46 = vrot.slane %v1683_v39, 9  ;;  %v4471_v39 = vld [vmem:[#allocation2 + $0x7c] sm:$0xf] }
 0x2ec   : > { %v1768_v44 = vrot.slane %v1682_v38, 5  ;;  %v1959_v38 = vrot.slane %v1691_v33, 5 }
 0x2ee   : > { %v1769_v50 = vsel %vm4350_vm13, %v1767_v27, %v1768_v44  ;;  %v1694_v27 = vld [vmem:[#allocation2 + $0x74] sm:$0x1]  ;;  %v2104_v44 = vrot.slane %v4471_v39, 5 }
 0x2f2   : > { %3651 = vmatmul.mubr.msk.bf16.vlgmr.msra.gmra.mxu0 %vm1291_vm10, %v4320_v57  ;;  %3669 = vmatmul.mubr.msk.bf16.vlgmr.msra.gmra.mxu1 %vm1291_vm10, %v3346_v56  ;;  %v1752_v57 = vsel %vm4350_vm13, %v3340_v61, %v1751_v47  ;;  %v1775_v47 = vrot.slane %v1685_v40, 5  ;;  %v3344_v61 = vrot.slane %v1686_v53, 9  ;;  %v4478_v40 = vld [vmem:[%s4988_s6 + $0x10] sm:$0x3]  ;;  %v4491_v53 = vld [vmem:[#allocation2 + $0x88] sm:$0xf] }
 0x2f3   : > { %3685 = vmatpush3.bf16.msra.mxu0 %v1981_v55  ;;  %3654 = vmatprep.mubr.msk.bf16.mxu0 %vm1291_vm10, %v4322_v58  ;;  %v1772_v58 = vrot.slane %v4401_v26, 5  ;;  %v3348_v41 = vcombine.low %v1752_v57, %v1755_v32  ;;  %v3350_v55 = vcombine.low %v1766_v49, %v1769_v50  ;;  %v4459_v57 = vld [vmem:[#allocation2 + $0x64] sm:$0xf]  ;;  %v1689_v32 = vld [vmem:[#allocation2 + $0x60] sm:$0xe]  ;;  %v1966_v50 = vrot.slane %v1694_v27, 5 }
 0x2f4   : > { %3672 = vmatprep.mubr.msk.bf16.mxu1 %vm1291_vm10, %v4395_v59  ;;  %3703 = vmatpush3.bf16.msra.mxu1 %v2129_v29  ;;  %v1780_v10 = vsel %vm4350_vm13, %v3344_v61, %v1779_v51  ;;  %v3361_v36 = vrot.slane %v1689_v32, 9  ;;  %v2249_v32 = vld [vmem:[#allocation2 + $0x20] sm:$0x3] }
 0x2f5   : > { %3804 = vmatprep.subr.msk.bf16.mxu0 %vm1316_vm9, %v1220_v60  ;;  %3805 = vmatprep.subr.msk.bf16.mxu1 %vm1316_vm9, %v4411_v30  ;;  %v1774_v31 = vrot.slane %v1772_v58, 4  ;;  %v1773_v52 = vsel %vm4350_vm13, %v3343_v46, %v1772_v58  ;;  %v4456_v29 = vcombine.low %v1780_v10, %v1783_v14  ;;  %v4468_v58 = vld [vmem:[#allocation2 + $0x70] sm:$0xf]  ;;  %v1695_v46 = vld [vmem:[#allocation2 + $0x78] sm:$0xe]  ;;  %v2111_v10 = vrot.slane %v4491_v53, 5 }
 0x2f6   : > { %v1963_v60 = vrot.slane %v4468_v58, 5  ;;  %v3373_v51 = vrot.slane %v1695_v46, 9  ;;  %v2244_v14 = vld [vmem:[#allocation2] sm:$0xc]  ;;  %v2246_v46 = vld [vmem:[#allocation2 + $0xc] sm:$0xc] }
 0x2f8   : > { %v1965_v49 = vrot.slane %v1963_v60, 4 }
 0x2fa   : > { %3655 = vmatmul.mubr.msk.bf16.gmra.mxu0 %vm1291_vm10, %v4342_v5  ;;  %3673 = vmatmul.mubr.msk.bf16.gmra.mxu1 %vm1291_vm10, %v3348_v41  ;;  %v1776_v5 = vsel %vm4350_vm13, %v1774_v31, %v1775_v47  ;;  %v3362_v47 = vrot.slane %v1692_v43, 9  ;;  %v1967_v61 = vsel %vm4350_vm13, %v1965_v49, %v1966_v50  ;;  %v2247_v50 = vld [vmem:[#allocation2 + $0x14] sm:$0x3] }
 0x2fb   : > { %3658 = vmatprep.mubr.msk.bf16.mxu0 %vm1291_vm10, %v4344_v0  ;;  %3676 = vmatprep.mubr.msk.bf16.mxu1 %vm1291_vm10, %v3349_v42  ;;  %v3861_v0 = vld [vmem:[#allocation2 + $0x78] sm:$0xff]   ;;  %v3351_v56 = vcombine.low %v1773_v52, %v1776_v5  ;;  %v2106_v52 = vrot.slane %v2104_v44, 4 }
 0x302   : > { %3659 = vmatmul.mubr.msk.bf16.gmra.mxu0 %vm1291_vm10, %v4368_v35  ;;  %3677 = vmatmul.mubr.msk.bf16.gmra.mxu1 %vm1291_vm10, %v3350_v55  ;;  %v1956_v35 = vrot.slane %v4459_v57, 5 }
 0x303   : > { %3662 = vmatprep.mubr.msk.bf16.mxu0 %vm1291_vm10, %v3861_v0  ;;  %3680 = vmatprep.mubr.msk.bf16.mxu1 %vm1291_vm10, %v3351_v56  ;;  %v1964_v0 = vsel %vm4350_vm13, %v3362_v47, %v1963_v60  ;;  %v3385_v60 = vrot.slane %v2244_v14, 10 }
 0x304   : > { %v1958_v37 = vrot.slane %v1956_v35, 4  ;;  %v3364_v33 = vcombine.low %v1964_v0, %v1967_v61  ;;  %v3386_v0 = vrot.slane %v2246_v46, 10  ;;  %v2253_v61 = vld [vmem:[#allocation2 + $0x38] sm:$0x3]  ;;  %v2257_v46 = vld [vmem:[#allocation2 + $0x50] sm:$0x3] }
 0x30a   : > { %3663 = vmatmul.mubr.msk.bf16.gmra.mxu0 %vm1291_vm10, %v3862_v18  ;;  %3681 = vmatmul.mubr.msk.bf16.gmra.mxu1 %vm1291_vm10, %v4456_v29  ;;  %v2303_v18 = vrot.slane %v4354_v25, 6  ;;  %v2310_v25 = vrot.slane %v4373_v28, 6 }
 0x30b   : > { %3686 = vmatprep.mubr.msk.bf16.mxu0 %vm1291_vm10, %v4395_v59  ;;  %3704 = vmatprep.mubr.msk.bf16.mxu1 %vm1291_vm10, %v3349_v42  ;;  %v2538_v59 = vsel %vm1316_vm9, %v4411_v30, 0  ;;  %v1960_v30 = vsel %vm4350_vm13, %v1958_v37, %v1959_v38  ;;  %v2291_v37 = vrot.slane %v2289_v54, 4 }
 0x30c   : > { %v2305_v27 = vrot.slane %v2303_v18, 4 }
 0x312   : > { %3687 = vmatmul.mubr.msk.bf16.vlgmr.msra.gmra.mxu0 %vm1291_vm10, %v3348_v41  ;;  %3705 = vmatmul.mubr.msk.bf16.vlgmr.msra.gmra.mxu1 %vm1291_vm10, %v3350_v55  ;;  %v1957_v41 = vsel %vm4350_vm13, %v3361_v36, %v1956_v35  ;;  %v2248_v35 = vld [vmem:[#allocation2 + $0x18] sm:$0xc]  ;;  %v2114_v36 = vrot.slane %v1700_v9, 5 }
 0x313   : > { %3721 = vmatpush3.bf16.msra.mxu0 %v2392_v34  ;;  %3690 = vmatprep.mubr.msk.bf16.mxu0 %vm1291_vm10, %v3349_v42  ;;  %v1697_v42 = vld [vmem:[#allocation2 + $0x80] sm:$0x1]  ;;  %v3363_v31 = vcombine.low %v1957_v41, %v1960_v30  ;;  %v3374_v34 = vrot.slane %v1698_v63, 9  ;;  %v2292_v41 = vrot.slane %v2245_v62, 6  ;;  %v3387_v43 = vrot.slane %v2248_v35, 10 }
 0x314   : > { %3708 = vmatprep.mubr.msk.bf16.mxu1 %vm1291_vm10, %v3351_v56  ;;  %3739 = vmatpush3.bf16.msra.mxu1 %v2538_v59  ;;  %v2107_v5 = vrot.slane %v1697_v42, 5  ;;  %v2113_v59 = vrot.slane %v2111_v10, 4  ;;  %v2296_v42 = vrot.slane %v4346_v1, 6  ;;  %v3389_v35 = vrot.slane %v2252_v24, 10 }
 0x315   : > { %3806 = vmatprep.subr.msk.bf16.mxu0 %vm1316_vm9, %v4478_v40  ;;  %v2112_v47 = vsel %vm4350_vm13, %v3374_v34, %v2111_v10  ;;  %v2293_v28 = vsel %vm4510_vm15, %v2291_v37, %v2292_v41  ;;  %v2299_v10 = vrot.slane %v2247_v50, 6  ;;  %v2255_v41 = vld [vmem:[#allocation2 + $0x44] sm:$0x3]  ;;  %v2513_v24 = vrot.slane %v4459_v57, 6 }
 0x316   : > { %v2115_v49 = vsel %vm4350_vm13, %v2113_v59, %v2114_v36 }
 0x317   : > { %v3376_v63 = vcombine.low %v2112_v47, %v2115_v49 }
 0x31a   : > { %3691 = vmatmul.mubr.msk.bf16.gmra.mxu0 %vm1291_vm10, %v3350_v55  ;;  %3709 = vmatmul.mubr.msk.bf16.gmra.mxu1 %vm1291_vm10, %v4456_v29  ;;  %v2105_v55 = vsel %vm4350_vm13, %v3373_v51, %v2104_v44  ;;  %v2306_v44 = vrot.slane %v2249_v32, 6  ;;  %v2250_v51 = vld [vmem:[#allocation2 + $0x24] sm:$0xc]  ;;  %v2320_v32 = vrot.slane %v2253_v61, 6  ;;  %v2260_v61 = vld [vmem:[#allocation2 + $0x60] sm:$0xc] }
 0x31b   : > { %3694 = vmatprep.mubr.msk.bf16.mxu0 %vm1291_vm10, %v3351_v56  ;;  %3712 = vmatprep.mubr.msk.bf16.mxu1 %vm1291_vm10, %v3363_v31  ;;  %v2108_v56 = vsel %vm4350_vm13, %v2106_v52, %v2107_v5  ;;  %v2251_v52 = vld [vmem:[#allocation2 + $0x2c] sm:$0x3]  ;;  %v2317_v5 = vrot.slane %v4378_v45, 6  ;;  %v3388_v14 = vrot.slane %v2250_v51, 10  ;;  %v2297_v45 = vsel %vm4510_vm15, %v3386_v0, %v2296_v42  ;;  %v2259_v0 = vld [vmem:[#allocation2 + $0x5c] sm:$0x3] }
 0x31c   : > { %v3375_v38 = vcombine.low %v2105_v55, %v2108_v56  ;;  %v2307_v1 = vsel %vm4510_vm15, %v2305_v27, %v2306_v44  ;;  %v2312_v55 = vrot.slane %v2310_v25, 4  ;;  %v2313_v62 = vrot.slane %v2251_v52, 6  ;;  %v2256_v44 = vld [vmem:[#allocation2 + $0x48] sm:$0xc] }
 0x31d   : > { %v2311_v36 = vsel %vm4510_vm15, %v3388_v14, %v2310_v25  ;;  %v2684_v25 = vsel %vm1316_vm9, %v4478_v40, 0  ;;  %v3409_v14 = vrot.slane %v2260_v61, 10 }
 0x31e   : > { %v2314_v37 = vsel %vm4510_vm15, %v2312_v55, %v2313_v62  ;;  %v2515_v62 = vrot.slane %v2513_v24, 4 }
 0x322   : > { %3695 = vmatmul.mubr.msk.bf16.gmra.mxu0 %vm1291_vm10, %v4456_v29  ;;  %3713 = vmatmul.mubr.msk.bf16.gmra.mxu1 %vm1291_vm10, %v3364_v33  ;;  %v2290_v29 = vsel %vm4510_vm15, %v3385_v60, %v2289_v54  ;;  %v2298_v54 = vrot.slane %v2296_v42, 4  ;;  %v2254_v60 = vld [vmem:[#allocation2 + $0x3c] sm:$0xc]  ;;  %v3396_v42 = vcombine.low %v2311_v36, %v2314_v37  ;;  %v2263_v36 = vld [vmem:[#allocation2 + $0x74] sm:$0x3] }
 0x323   : > { %3698 = vmatprep.mubr.msk.bf16.mxu0 %vm1291_vm10, %v3363_v31  ;;  %3716 = vmatprep.mubr.msk.bf16.mxu1 %vm1291_vm10, %v3375_v38  ;;  %v2304_v31 = vsel %vm4510_vm15, %v3387_v43, %v2303_v18  ;;  %v3393_v9 = vcombine.low %v2290_v29, %v2293_v28  ;;  %v2319_v18 = vrot.slane %v2317_v5, 4  ;;  %v2318_v38 = vsel %vm4510_vm15, %v3389_v35, %v2317_v5  ;;  %v2258_v5 = vld [vmem:[#allocation2 + $0x54] sm:$0xc] }
 0x324   : > { %v3395_v56 = vcombine.low %v2304_v31, %v2307_v1  ;;  %v2300_v34 = vsel %vm4510_vm15, %v2298_v54, %v2299_v10  ;;  %v2331_v43 = vrot.slane %v4401_v26, 6  ;;  %v3390_v49 = vrot.slane %v2254_v60, 10 }
 0x325   : > { %v2321_v59 = vsel %vm4510_vm15, %v2319_v18, %v2320_v32  ;;  %v3394_v27 = vcombine.low %v2297_v45, %v2300_v34  ;;  %v2327_v29 = vrot.slane %v2255_v41, 6  ;;  %v3391_v28 = vrot.slane %v2256_v44, 10  ;;  %v2262_v34 = vld [vmem:[#allocation2 + $0x6c] sm:$0xc]  ;;  %v2264_v44 = vld [vmem:[#allocation2 + $0x78] sm:$0xc] }
 0x326   : > { %v3397_v47 = vcombine.low %v2318_v38, %v2321_v59  ;;  %v2333_v50 = vrot.slane %v2331_v43, 4  ;;  %v2334_v31 = vrot.slane %v2257_v46, 6  ;;  %v2338_v1 = vrot.slane %v4430_v48, 6  ;;  %v2265_v46 = vld [vmem:[#allocation2 + $0x80] sm:$0x3] }
 0x327   : > { %v2332_v51 = vsel %vm4510_vm15, %v3391_v28, %v2331_v43  ;;  %v3392_v10 = vrot.slane %v2258_v5, 10  ;;  %v2520_v18 = vrot.slane %v4468_v58, 6  ;;  %v2514_v32 = vsel %vm4510_vm15, %v3409_v14, %v2513_v24  ;;  %v2266_v28 = vld [vmem:[#allocation2 + $0x84] sm:$0xc] }
 0x328   : > { %v2335_v52 = vsel %vm4510_vm15, %v2333_v50, %v2334_v31  ;;  %v2340_v55 = vrot.slane %v2338_v1, 4  ;;  %v3410_v38 = vrot.slane %v2262_v34, 10  ;;  %v2523_v60 = vrot.slane %v2263_v36, 6  ;;  %v2267_v50 = vld [vmem:[#allocation2 + $0x8c] sm:$0x3] }
 0x329   : > { %v3399_v54 = vcombine.low %v2332_v51, %v2335_v52  ;;  %v2339_v57 = vsel %vm4510_vm15, %v3392_v10, %v2338_v1  ;;  %v2522_v59 = vrot.slane %v2520_v18, 4  ;;  %v3422_v31 = vrot.slane %v2266_v28, 10  ;;  %v2869_v52 = vld [vmem:[%s4991_s9] sm:$0x3] }
 0x32a   : > { %3699 = vmatmul.mubr.msk.bf16.gmra.mxu0 %vm1291_vm10, %v3364_v33  ;;  %3717 = vmatmul.mubr.msk.bf16.gmra.mxu1 %vm1291_vm10, %v3376_v63  ;;  %v2324_v33 = vrot.slane %v4397_v19, 6  ;;  %v2261_v63 = vld [vmem:[#allocation2 + $0x68] sm:$0x3]  ;;  %v2521_v58 = vsel %vm4510_vm15, %v3410_v38, %v2520_v18  ;;  %v2895_v5 = vsel %vm1316_vm9, %v2869_v52, 0 }
 0x32b   : > { %3722 = vmatprep.mubr.msk.bf16.mxu0 %vm1291_vm10, %v3393_v9  ;;  %3740 = vmatprep.mubr.msk.bf16.mxu1 %vm1291_vm10, %v3395_v56  ;;  %v2516_v48 = vrot.slane %v2261_v63, 6  ;;  %v2524_v41 = vsel %vm4510_vm15, %v2522_v59, %v2523_v60 }
 0x32c   : > { %v2326_v19 = vrot.slane %v2324_v33, 4  ;;  %v2325_v26 = vsel %vm4510_vm15, %v3390_v49, %v2324_v33  ;;  %v3412_v43 = vcombine.low %v2521_v58, %v2524_v41  ;;  %v2662_v49 = vrot.slane %v2265_v46, 6  ;;  %3807 = vmatprep.subr.msk.bf16.mxu1 %vm1316_vm9, %v2869_v52 }
 0x32d   : > { %v2517_v45 = vsel %vm4510_vm15, %v2515_v62, %v2516_v48 }
 0x32e   : > { %v2328_v40 = vsel %vm4510_vm15, %v2326_v19, %v2327_v29  ;;  %v3411_v33 = vcombine.low %v2514_v32, %v2517_v45  ;;  %v2666_v19 = vrot.slane %v4491_v53, 6 }
 0x32f   : > { %v3398_v9 = vcombine.low %v2325_v26, %v2328_v40  ;;  %v2669_v40 = vrot.slane %v2267_v50, 6 }
 0x330   : > { %v2668_v26 = vrot.slane %v2666_v19, 4  ;;  %v2667_v1 = vsel %vm4510_vm15, %v3422_v31, %v2666_v19 }
 0x332   : > { %3723 = vmatmul.mubr.msk.bf16.vlgmr.msra.gmra.mxu0 %vm1291_vm10, %v3394_v27  ;;  %3741 = vmatmul.mubr.msk.bf16.vlgmr.msra.gmra.mxu1 %vm1291_vm10, %v3396_v42  ;;  %v2659_v27 = vrot.slane %v4471_v39, 6  ;;  %v2670_v53 = vsel %vm4510_vm15, %v2668_v26, %v2669_v40 }
 0x333   : > { %3757 = vmatpush3.bf16.msra.mxu0 %v2684_v25  ;;  %3726 = vmatprep.mubr.msk.bf16.mxu0 %vm1291_vm10, %v3395_v56  ;;  %v2341_v56 = vrot.slane %v2259_v0, 6  ;;  %v3421_v25 = vrot.slane %v2264_v44, 10  ;;  %v3424_v51 = vcombine.low %v2667_v1, %v2670_v53 }
 0x334   : > { %3744 = vmatprep.mubr.msk.bf16.mxu1 %vm1291_vm10, %v3397_v47  ;;  %3775 = vmatpush3.bf16.msra.mxu1 %v2895_v5 }
 0x335   : > { %v2342_v35 = vsel %vm4510_vm15, %v2340_v55, %v2341_v56 }
 0x336   : > { %v3400_v37 = vcombine.low %v2339_v57, %v2342_v35 }
 0x33a   : > { %3727 = vmatmul.mubr.msk.bf16.gmra.mxu0 %vm1291_vm10, %v3396_v42  ;;  %3745 = vmatmul.mubr.msk.bf16.gmra.mxu1 %vm1291_vm10, %v3398_v9  ;;  %v2661_v42 = vrot.slane %v2659_v27, 4 }
 0x33b   : > { %3730 = vmatprep.mubr.msk.bf16.mxu0 %vm1291_vm10, %v3397_v47  ;;  %3748 = vmatprep.mubr.msk.bf16.mxu1 %vm1291_vm10, %v3399_v54 }
 0x33c   : > { %v2663_v29 = vsel %vm4510_vm15, %v2661_v42, %v2662_v49 }
 0x342   : > { %3731 = vmatmul.mubr.msk.bf16.gmra.mxu0 %vm1291_vm10, %v3398_v9  ;;  %3749 = vmatmul.mubr.msk.bf16.gmra.mxu1 %vm1291_vm10, %v3400_v37 }
 0x343   : > { %3734 = vmatprep.mubr.msk.bf16.mxu0 %vm1291_vm10, %v3399_v54  ;;  %3752 = vmatprep.mubr.msk.bf16.mxu1 %vm1291_vm10, %v3411_v33 }
 0x34a   : > { %3735 = vmatmul.mubr.msk.bf16.gmra.mxu0 %vm1291_vm10, %v3400_v37  ;;  %3753 = vmatmul.mubr.msk.bf16.gmra.mxu1 %vm1291_vm10, %v3412_v43 }
 0x34b   : > { %3758 = vmatprep.mubr.msk.bf16.mxu0 %vm1291_vm10, %v3397_v47  ;;  %v2660_v47 = vsel %vm4510_vm15, %v3421_v25, %v2659_v27 }
 0x34c   : > { %v3423_v39 = vcombine.low %v2660_v47, %v2663_v29 }
 0x352   : > { %3759 = vmatmul.mubr.msk.bf16.vlgmr.msra.gmra.mxu0 %vm1291_vm10, %v3398_v9 }
 0x353   : > { %3762 = vmatprep.mubr.msk.bf16.mxu0 %vm1291_vm10, %v3399_v54 }
 0x35a   : > { %3763 = vmatmul.mubr.msk.bf16.gmra.mxu0 %vm1291_vm10, %v3400_v37 }
 0x35b   : > { %3766 = vmatprep.mubr.msk.bf16.mxu0 %vm1291_vm10, %v3411_v33 }
 0x362   : > { %3767 = vmatmul.mubr.msk.bf16.gmra.mxu0 %vm1291_vm10, %v3412_v43 }
 0x363   : > { %3770 = vmatprep.mubr.msk.bf16.mxu0 %vm1291_vm10, %v3423_v39 }
 0x36a   : > { %3771 = vmatmul.mubr.msk.bf16.gmra.mxu0 %vm1291_vm10, %v3424_v51 }
 0x392   : > { %v3616_v0 = vpop.f32.mrf.mxu0  ;;  %v3634_v24 = vpop.f32.mrf.mxu1 }
 0x393   : > { %v1479_v61 = vadd.f32 %v3634_v24, %v3616_v0 }
 0x394   : > { %v1354_v63 = vpop.f32.mrf.mxu0  ;;  %v1470_v9 = vpop.f32.mrf.mxu1 }
 0x395   : > { %v1471_v54 = vadd.f32 %v1470_v9, %v1354_v63 }
 0x396   : > { %v3617_v30 = vpop.f32.mrf.mxu0  ;;  %v3635_v10 = vpop.f32.mrf.mxu1 }
 0x397   : > { %v1482_v55 = vadd.f32 %v3635_v10, %v3617_v30 }
 0x398   : > { %v1357_v56 = vpop.f32.mrf.mxu0  ;;  %v1473_v14 = vpop.f32.mrf.mxu1 }
 0x399   : > { %v1474_v62 = vadd.f32 %v1473_v14, %v1357_v56 }
 0x39a   : > { %v3620_v48 = vpop.f32.mrf.mxu0  ;;  %v3638_v57 = vpop.f32.mrf.mxu1 }
 0x39b   : > { %v1495_v35 = vadd.f32 %v3638_v57, %v3620_v48 }
 0x39c   : > { %v1370_v18 = vpop.f32.mrf.mxu0  ;;  %v1486_v32 = vpop.f32.mrf.mxu1 }
 0x39d   : > { %v1487_v45 = vadd.f32 %v1486_v32, %v1370_v18 }
 0x39e   : > { %v3621_v34 = vpop.f32.mrf.mxu0  ;;  %v3639_v36 = vpop.f32.mrf.mxu1 }
 0x39f   : > { %v1498_v37 = vadd.f32 %v3639_v36, %v3621_v34 }
 0x3a0   : > { %v1373_v33 = vpop.f32.mrf.mxu0  ;;  %v1489_v38 = vpop.f32.mrf.mxu1 }
 0x3a1   : > { %v1490_v59 = vadd.f32 %v1489_v38, %v1373_v33 }
 0x3a2   : > { %v3624_v60 = vpop.f32.mrf.mxu0  ;;  %v3642_v58 = vpop.f32.mrf.mxu1 }
 0x3a3   : > { %v1511_v41 = vadd.f32 %v3642_v58, %v3624_v60 }
 0x3a4   : > { %v1386_v43 = vpop.f32.mrf.mxu0  ;;  %v1502_v27 = vpop.f32.mrf.mxu1 }
 0x3a5   : > { %v1503_v44 = vadd.f32 %v1502_v27, %v1386_v43 }
 0x3a6   : > { %v3625_v46 = vpop.f32.mrf.mxu0  ;;  %v3643_v25 = vpop.f32.mrf.mxu1 }
 0x3a7   : > { %v1514_v42 = vadd.f32 %v3643_v25, %v3625_v46 }
 0x3a8   : > { %v1389_v49 = vpop.f32.mrf.mxu0  ;;  %v1505_v19 = vpop.f32.mrf.mxu1 }
 0x3a9   : > { %v1506_v47 = vadd.f32 %v1505_v19, %v1389_v49 }
 0x3aa   : > { %v3628_v29 = vpop.f32.mrf.mxu0  ;;  %v3646_v28 = vpop.f32.mrf.mxu1 }
 0x3ab   : > { %v1527_v50 = vadd.f32 %v3646_v28, %v3628_v29 }
 0x3ac   : > { %v1402_v39 = vpop.f32.mrf.mxu0  ;;  %v1518_v31 = vpop.f32.mrf.mxu1 }
 0x3ad   : > { %v1519_v26 = vadd.f32 %v1518_v31, %v1402_v39 }
 0x3ae   : > { %v3629_v40 = vpop.f32.mrf.mxu0  ;;  %v3647_v1 = vpop.f32.mrf.mxu1 }
 0x3af   : > { %v1530_v53 = vadd.f32 %v3647_v1, %v3629_v40 }
 0x3b0   : > { %v1405_v51 = vpop.f32.mrf.mxu0  ;;  %v1521_v52 = vpop.f32.mrf.mxu1 }
 0x3b1   : > { %v1522_v5 = vadd.f32 %v1521_v52, %v1405_v51 }
 0x3b2   : > { %v3652_v0 = vpop.f32.mrf.mxu0  ;;  %v4616_v63 = vpop.f32.mrf.mxu1 }
 0x3b3   : > { %v4614_v24 = vadd.f32 %v3652_v0, %v1479_v61 }
 0x3b4   : > { %v1586_v9 = vpop.f32.mrf.mxu0  ;;  %v4620_v10 = vpop.f32.mrf.mxu1 }
 0x3b5   : > { %v4618_v30 = vadd.f32 %v1586_v9, %v1471_v54 }
 0x3b6   : > { %v3653_v56 = vpop.f32.mrf.mxu0  ;;  %v4624_v48 = vpop.f32.mrf.mxu1 }
 0x3b7   : > { %v4622_v14 = vadd.f32 %v3653_v56, %v1482_v55 }
 0x3b8   : > { %v1589_v57 = vpop.f32.mrf.mxu0  ;;  %v4628_v32 = vpop.f32.mrf.mxu1 }
 0x3b9   : > { %v4626_v18 = vadd.f32 %v1589_v57, %v1474_v62 }
 0x3ba   : > { %v3656_v34 = vpop.f32.mrf.mxu0  ;;  %v4632_v36 = vpop.f32.mrf.mxu1 }
 0x3bb   : > { %v4630_v61 = vadd.f32 %v3656_v34, %v1495_v35 }
 0x3bc   : > { %v1602_v33 = vpop.f32.mrf.mxu0  ;;  %v4636_v38 = vpop.f32.mrf.mxu1 }
 0x3bd   : > { %v4634_v54 = vadd.f32 %v1602_v33, %v1487_v45 }
 0x3be   : > { %v3657_v60 = vpop.f32.mrf.mxu0  ;;  %v4640_v58 = vpop.f32.mrf.mxu1 }
 0x3bf   : > { %v4638_v55 = vadd.f32 %v3657_v60, %v1498_v37 }
 0x3c0   : > { %v1605_v43 = vpop.f32.mrf.mxu0  ;;  %v4644_v27 = vpop.f32.mrf.mxu1 }
 0x3c1   : > { %v4642_v62 = vadd.f32 %v1605_v43, %v1490_v59 }
 0x3c2   : > { %v3660_v46 = vpop.f32.mrf.mxu0  ;;  %v3678_v25 = vpop.f32.mrf.mxu1 }
 0x3c3   : > { %v1659_v35 = vadd.f32 %v3660_v46, %v1511_v41 }
 0x3c4   : > { %v1618_v49 = vpop.f32.mrf.mxu0  ;;  %v4648_v29 = vpop.f32.mrf.mxu1 }
 0x3c5   : > { %v4646_v19 = vadd.f32 %v1618_v49, %v1503_v44  ;;  %v1942_v45 = vadd.f32 %v3678_v25, %v1659_v35 }
 0x3c6   : > { %v3661_v28 = vpop.f32.mrf.mxu0  ;;  %v4652_v37 = vpop.f32.mrf.mxu1 }
 0x3c7   : > { %v4650_v39 = vadd.f32 %v3661_v28, %v1514_v42 }
 0x3c8   : > { %v1621_v31 = vpop.f32.mrf.mxu0  ;;  %v4656_v59 = vpop.f32.mrf.mxu1 }
 0x3c9   : > { %v4654_v40 = vadd.f32 %v1621_v31, %v1506_v47 }
 0x3ca   : > { %v3664_v1 = vpop.f32.mrf.mxu0  ;;  %v3682_v41 = vpop.f32.mrf.mxu1 }
 0x3cb   : > { %v1663_v51 = vadd.f32 %v3664_v1, %v1527_v50 }
 0x3cc   : > { %v1634_v52 = vpop.f32.mrf.mxu0  ;;  %v4660_v9 = vpop.f32.mrf.mxu1 }
 0x3cd   : > { %v4658_v0 = vadd.f32 %v1634_v52, %v1519_v26  ;;  %v1946_v44 = vadd.f32 %v3682_v41, %v1663_v51 }
 0x3ce   : > { %v3665_v56 = vpop.f32.mrf.mxu0  ;;  %v4664_v42 = vpop.f32.mrf.mxu1 }
 0x3cf   : > { %v4662_v57 = vadd.f32 %v3665_v56, %v1530_v53 }
 0x3d0   : > { %v1637_v34 = vpop.f32.mrf.mxu0  ;;  %v4668_v47 = vpop.f32.mrf.mxu1 }
 0x3d1   : > { %v4666_v33 = vadd.f32 %v1637_v34, %v1522_v5 }
 0x3d2   : > { %v3688_v60 = vpop.f32.mrf.mxu0  ;;  %v3706_v43 = vpop.f32.mrf.mxu1 }
 0x3d4   : > { %v2017_v50 = vpop.f32.mrf.mxu0  ;;  %v2165_v46 = vpop.f32.mrf.mxu1 }
 0x3d6   : > { %v3689_v35 = vpop.f32.mrf.mxu0  ;;  %v4670_v26 = vpop.f32.mrf.mxu1 }
 0x3d8   : > { %v2020_v25 = vpop.f32.mrf.mxu0  ;;  %v4672_v49 = vpop.f32.mrf.mxu1 }
 0x3da   : > { %v4674_v28 = vpop.f32.mrf.mxu0  ;;  %v4676_v53 = vpop.f32.mrf.mxu1 }
 0x3dc   : > { %v4678_v31 = vpop.f32.mrf.mxu0  ;;  %v4680_v5 = vpop.f32.mrf.mxu1 }
 0x3de   : > { %v4682_v1 = vpop.f32.mrf.mxu0  ;;  %v4684_v51 = vpop.f32.mrf.mxu1 }
 0x3e0   : > { %v4686_v41 = vpop.f32.mrf.mxu0  ;;  %v4688_v52 = vpop.f32.mrf.mxu1 }
 0x3e1   : > { %5038 = vst [vmem:[#allocation20_spill] sm:$0xff] %v4688_v52 }
 0x3e2   : > { %v3696_v56 = vpop.f32.mrf.mxu0  ;;  %v4692_v17 = vpop.f32.mrf.mxu1 }
 0x3e3   : > { %v4690_v34 = vadd.f32 %v3696_v56, %v1942_v45  ;;  %5040 = vst [vmem:[#allocation22_spill] sm:$0xff] %v4692_v17  ;;  %v1934_v17 = vadd.f32 %v4616_v63, %v4614_v24 }
 0x3e4   : > { %v4694_v23 = vpop.f32.mrf.mxu0  ;;  %v4696_v16 = vpop.f32.mrf.mxu1 }
 0x3e5   : > { %5039 = vst [vmem:[#allocation21_spill] sm:$0xff] %v4690_v34  ;;  %5041 = vst [vmem:[#allocation23_spill] sm:$0xff] %v4694_v23  ;;  %v2082_v23 = vadd.f32 %v3688_v60, %v1934_v17  ;;  %v1938_v17 = vadd.f32 %v4632_v36, %v4630_v61  ;;  %v1939_v61 = vadd.f32 %v4640_v58, %v4638_v55 }
 0x3e6   : > { %5042 = vst [vmem:[#allocation24_spill] sm:$0xff] %v4696_v16  ;;  %v4698_v22 = vpop.f32.mrf.mxu0  ;;  %v4700_v6 = vpop.f32.mrf.mxu1  ;;  %v1937_v36 = vadd.f32 %v4644_v27, %v4642_v62  ;;  %v1943_v55 = vadd.f32 %v4652_v37, %v4650_v39  ;;  %v1944_v39 = vadd.f32 %v4660_v9, %v4658_v0  ;;  %v1947_v37 = vadd.f32 %v4664_v42, %v4662_v57 }
 0x3e7   : > { %5043 = vst [vmem:[#allocation25_spill] sm:$0xff] %v4698_v22  ;;  %5044 = vst [vmem:[#allocation26_spill] sm:$0xff] %v4700_v6  ;;  %v1932_v22 = vadd.f32 %v4620_v10, %v4618_v30  ;;  %v2230_v24 = vadd.f32 %v3706_v43, %v2082_v23  ;;  %v2086_v23 = vadd.f32 %v4674_v28, %v1938_v17 }
 0x3e8   : > { %v4702_v12 = vpop.f32.mrf.mxu0  ;;  %v4704_v4 = vpop.f32.mrf.mxu1  ;;  %v2087_v58 = vadd.f32 %v4682_v1, %v1939_v61  ;;  %v2085_v27 = vadd.f32 %v4686_v41, %v1937_v36  ;;  %v5062_v9 = vld [vmem:[#allocation20_spill] sm:$0xff] }
 0x3e9   : > { %5045 = vst [vmem:[#allocation27_spill] sm:$0xff] %v4702_v12  ;;  %5046 = vst [vmem:[#allocation28_spill] sm:$0xff] %v4704_v4 }
 0x3ea   : > { %v3700_v11 = vpop.f32.mrf.mxu0  ;;  %v4708_v21 = vpop.f32.mrf.mxu1  ;;  %v2235_v0 = vadd.f32 %v4684_v51, %v2087_v58  ;;  %v2233_v1 = vadd.f32 %v5062_v9, %v2085_v27 }
 0x3eb   : > { %v4706_v15 = vadd.f32 %v3700_v11, %v1946_v44  ;;  %5048 = vst [vmem:[#allocation30_spill] sm:$0xff] %v4708_v21 }
 0x3ec   : > { %v4710_v45 = vpop.f32.mrf.mxu0  ;;  %v4712_v56 = vpop.f32.mrf.mxu1  ;;  %v5063_v57 = vld [vmem:[#allocation23_spill] sm:$0xff] }
 0x3ed   : > { %5047 = vst [vmem:[#allocation29_spill] sm:$0xff] %v4706_v15  ;;  %5049 = vst [vmem:[#allocation31_spill] sm:$0xff] %v4710_v45  ;;  %v5071_v36 = vld [vmem:[#allocation24_spill] sm:$0xff] }
 0x3ee   : > { %5050 = vst [vmem:[#allocation32_spill] sm:$0xff] %v4712_v56  ;;  %v4714_v13 = vpop.f32.mrf.mxu0  ;;  %v4716_v20 = vpop.f32.mrf.mxu1  ;;  %v5064_v41 = vld [vmem:[#allocation25_spill] sm:$0xff] }
 0x3ef   : > { %5051 = vst [vmem:[#allocation33_spill] sm:$0xff] %v4714_v13  ;;  %5052 = vst [vmem:[#allocation34_spill] sm:$0xff] %v4716_v20 }
 0x3f0   : > { %v4718_v3 = vpop.f32.mrf.mxu0  ;;  %v4720_v8 = vpop.f32.mrf.mxu1 }
 0x3f1   : > { %5053 = vst [vmem:[#allocation35_spill] sm:$0xff] %v4718_v3  ;;  %5054 = vst [vmem:[#allocation36_spill] sm:$0xff] %v4720_v8 }
 0x3f2   : > { %v3724_v2 = vpop.f32.mrf.mxu0  ;;  %v3742_v7 = vpop.f32.mrf.mxu1 }
 0x3f3   : > { %v2493_v60 = vadd.f32 %v3724_v2, %v2230_v24 }
 0x3f4   : > { %v2428_v4 = vpop.f32.mrf.mxu0  ;;  %v2574_v6 = vpop.f32.mrf.mxu1 }
 0x3f6   : > { %v3725_v11 = vpop.f32.mrf.mxu0  ;;  %v3743_v15 = vpop.f32.mrf.mxu1 }
 0x3f8   : > { %v2431_v44 = vpop.f32.mrf.mxu0  ;;  %v4722_v12 = vpop.f32.mrf.mxu1 }
 0x3fa   : > { %v3728_v21 = vpop.f32.mrf.mxu0  ;;  %v4726_v13 = vpop.f32.mrf.mxu1 }
 0x3fb   : > { %5056 = vst [vmem:[#allocation38_spill] sm:$0xff] %v4726_v13 }
 0x3fc   : > { %v2444_v45 = vpop.f32.mrf.mxu0  ;;  %v4732_v8 = vpop.f32.mrf.mxu1 }
 0x3fd   : > { %5059 = vst [vmem:[#allocation41_spill] sm:$0xff] %v4732_v8 }
 0x3fe   : > { %v4724_v56 = vpop.f32.mrf.mxu0 }
 0x3ff   : > { %5055 = vst [vmem:[#allocation37_spill] sm:$0xff] %v4724_v56  ;;  %v4742_v56 = vpop.f32.mrf.mxu1 }
 0x400   : > { %v4728_v20 = vpop.f32.mrf.mxu0 }
 0x401   : > { %5057 = vst [vmem:[#allocation39_spill] sm:$0xff] %v4728_v20  ;;  %v2080_v20 = vadd.f32 %v2017_v50, %v1932_v22  ;;  %v1936_v22 = vadd.f32 %v4636_v38, %v4634_v54  ;;  %v1940_v54 = vadd.f32 %v4648_v29, %v4646_v19  ;;  %v4779_v38 = vld [vmem:[%s4989_s7] ss:$0 sm:$0xff]  ;;  %v2234_v50 = vadd.f32 %v4676_v53, %v2086_v23 }
 0x402   : > { %v4730_v3 = vpop.f32.mrf.mxu0  ;;  %v5065_v24 = vld [vmem:[#allocation38_spill] sm:$0xff] }
 0x403   : > { %5058 = vst [vmem:[#allocation40_spill] sm:$0xff] %v4730_v3  ;;  %v1935_v3 = vadd.f32 %v4624_v48, %v4622_v14  ;;  %v2228_v30 = vadd.f32 %v2165_v46, %v2080_v20  ;;  %v2088_v42 = vadd.f32 %v5063_v57, %v1940_v54 }
 0x404   : > { %v4734_v16 = vpop.f32.mrf.mxu0 }
 0x405   : > { %5060 = vst [vmem:[#allocation42_spill] sm:$0xff] %v4734_v16  ;;  %v1933_v16 = vadd.f32 %v4628_v32, %v4626_v18  ;;  %v2083_v63 = vadd.f32 %v3689_v35, %v1935_v3  ;;  %v2491_v3 = vadd.f32 %v2428_v4, %v2228_v30  ;;  %v2084_v18 = vadd.f32 %v4678_v31, %v1936_v22  ;;  %v4799_v31 = vld [vmem:[%s4990_s8] ss:$0 sm:$0xff]  ;;  %v5069_v22 = vld [vmem:[#allocation41_spill] sm:$0xff] }
 0x406   : > { %v4738_v34 = vpop.f32.mrf.mxu0  ;;  %v5067_v30 = vld [vmem:[#allocation22_spill] sm:$0xff]  ;;  %v2236_v54 = vadd.f32 %v5071_v36, %v2088_v42  ;;  %v5077_v42 = vld [vmem:[#allocation31_spill] sm:$0xff] }
 0x407   : > { %5061 = vst [vmem:[#allocation43_spill] sm:$0xff] %v4738_v34  ;;  %v4752_v34 = vpop.f32.mrf.mxu1  ;;  %v2081_v10 = vadd.f32 %v2020_v25, %v1933_v16  ;;  %v2231_v48 = vadd.f32 %v4670_v26, %v2083_v63  ;;  %v2639_v16 = vadd.f32 %v3742_v7, %v2493_v60  ;;  %v2637_v46 = vadd.f32 %v2574_v6, %v2491_v3  ;;  %v5068_v60 = vld [vmem:[#allocation37_spill] sm:$0xff] }
 0x408   : > { %v4744_v13 = vpop.f32.mrf.mxu0  ;;  %v2232_v62 = vadd.f32 %v4680_v5, %v2084_v18  ;;  %v2497_v25 = vadd.f32 %v3728_v21, %v2234_v50  ;;  %v1941_v6 = vadd.f32 %v4656_v59, %v4654_v40  ;;  %v1945_v21 = vadd.f32 %v4668_v47, %v4666_v33  ;;  %v5066_v47 = vld [vmem:[#allocation21_spill] sm:$0xff]  ;;  %v5070_v23 = vld [vmem:[#allocation39_spill] sm:$0xff] }
 0x409   : > { %v4765_v32 = vpop.f32.mrf.mxu1  ;;  %v2229_v20 = vadd.f32 %v4672_v49, %v2081_v10  ;;  %v2494_v2 = vadd.f32 %v3725_v11, %v2231_v48  ;;  %v2238_v10 = vadd.f32 %v5067_v30, %v5066_v47  ;;  %v2498_v51 = vadd.f32 %v5068_v60, %v2235_v0 }
 0x40a   : > { %v4748_v8 = vpop.f32.mrf.mxu0  ;;  %v2495_v53 = vadd.f32 %v2444_v45, %v2232_v62  ;;  %v2091_v45 = vadd.f32 %v5064_v41, %v1943_v55  ;;  %v2643_v63 = vadd.f32 %v5065_v24, %v2497_v25  ;;  %v2496_v3 = vadd.f32 %v5070_v23, %v2233_v1  ;;  %v5076_v1 = vld [vmem:[#allocation28_spill] sm:$0xff] }
 0x40b   : > { %v2492_v7 = vadd.f32 %v2431_v44, %v2229_v20  ;;  %v4787_v19 = vpop.f32.mrf.mxu1  ;;  %v2640_v26 = vadd.f32 %v3743_v15, %v2494_v2  ;;  %v2092_v41 = vadd.f32 %v5077_v42, %v1944_v39 }
 0x40c   : > { %v4754_v52 = vpop.f32.mrf.mxu0  ;;  %v2641_v48 = vadd.f32 %v5069_v22, %v2495_v53  ;;  %v5075_v53 = vld [vmem:[#allocation42_spill] sm:$0xff] }
 0x40d   : > { %v2638_v5 = vadd.f32 %v4722_v12, %v2492_v7  ;;  %v3751_v11 = vpop.f32.mrf.mxu1 }
 0x40e   : > { %v4760_v14 = vpop.f32.mrf.mxu0 }
 0x40f   : > { %v2609_v58 = vpop.f32.mrf.mxu1 }
 0x410   : > { %v4767_v43 = vpop.f32.mrf.mxu0 }
 0x411   : > { %v3754_v24 = vpop.f32.mrf.mxu1 }
 0x412   : > { %v3760_v4 = vpop.f32.mrf.mxu0 }
 0x413   : > { %v2785_v35 = vadd.f32 %v3760_v4, %v2639_v16  ;;  %v5072_v4 = vld [vmem:[#allocation27_spill] sm:$0xff] }
 0x414   : > { %v2720_v29 = vpop.f32.mrf.mxu0  ;;  %v2089_v50 = vadd.f32 %v5072_v4, %v1941_v6 }
 0x415   : > { %v2808_v49 = vmul.f32 %v4779_v38, %v2785_v35  ;;  %v2783_v28 = vadd.f32 %v2720_v29, %v2637_v46  ;;  %v5073_v46 = vld [vmem:[#allocation26_spill] sm:$0xff]  ;;  %v5074_v35 = vld [vmem:[#allocation40_spill] sm:$0xff] }
 0x416   : > { %v3761_v15 = vpop.f32.mrf.mxu0  ;;  %v2239_v7 = vadd.f32 %v5073_v46, %v2091_v45  ;;  %v2501_v55 = vadd.f32 %v5074_v35, %v2238_v10  ;;  %v2237_v57 = vadd.f32 %v5076_v1, %v2089_v50  ;;  %v5078_v45 = vld [vmem:[#allocation43_spill] sm:$0xff]  ;;  %v5081_v10 = vld [vmem:[#allocation33_spill] sm:$0xff] }
 0x417   : > { %v2806_v40 = vmul.f32 %v4779_v38, %v2783_v28  ;;  %v2786_v59 = vadd.f32 %v3761_v15, %v2640_v26  ;;  %v2831_v17 = vadd.f32 %v4799_v31, %v2808_v49  ;;  %v2644_v49 = vadd.f32 %v4742_v56, %v2498_v51  ;;  %v5082_v51 = vld [vmem:[#allocation35_spill] sm:$0xff] }
 0x418   : > { %v2723_v44 = vpop.f32.mrf.mxu0  ;;  %v2642_v28 = vadd.f32 %v4752_v34, %v2496_v3  ;;  %v2499_v15 = vadd.f32 %v5075_v53, %v2236_v54  ;;  %v5079_v34 = vld [vmem:[#allocation29_spill] sm:$0xff]  ;;  %v2095_v60 = vadd.f32 %v5081_v10, %v1947_v37  ;;  %v2093_v22 = vadd.f32 %v5082_v51, %v1945_v21  ;;  %v2622_v21 = vpop.f32.mrf.mxu1 }
 0x419   : > { %v2809_v33 = vmul.f32 %v4779_v38, %v2786_v59  ;;  %v2784_v12 = vadd.f32 %v2723_v44, %v2638_v5  ;;  %v2829_v20 = vadd.f32 %v4799_v31, %v2806_v40  ;;  %v2847_v27 = vmax.f32 %v2831_v17, 0.0  ;;  %v5080_v17 = vld [vmem:[#allocation30_spill] sm:$0xff] }
 0x41a   : > { %v3764_v18 = vpop.f32.mrf.mxu0  ;;  %v2502_v44 = vadd.f32 %v5078_v45, %v2239_v7  ;;  %v2645_v3 = vadd.f32 %v4787_v19, %v2499_v15  ;;  %v2500_v37 = vadd.f32 %v4744_v13, %v2237_v57  ;;  %v5084_v7 = vld [vmem:[#allocation34_spill] sm:$0xff]  ;;  %v3755_v53 = vpop.f32.mrf.mxu1 }
 0x41b   : > { %v2832_v16 = vadd.f32 %v4799_v31, %v2809_v33  ;;  %v2807_v2 = vmul.f32 %v4779_v38, %v2784_v12  ;;  %v2789_v61 = vadd.f32 %v3764_v18, %v2643_v63  ;;  %v2845_v40 = vmax.f32 %v2829_v20, 0.0 }
 0x41c   : > { %v2736_v62 = vpop.f32.mrf.mxu0  ;;  %v2242_v33 = vadd.f32 %v5080_v17, %v5079_v34  ;;  %v2647_v12 = vadd.f32 %v4765_v32, %v2501_v55  ;;  %v5083_v32 = vld [vmem:[#allocation32_spill] sm:$0xff]  ;;  %v2243_v35 = vadd.f32 %v5084_v7, %v2095_v60  ;;  %v2625_v45 = vpop.f32.mrf.mxu1 }
 0x41d   : > { %v2848_v29 = vmax.f32 %v2832_v16, 0.0  ;;  %v2830_v26 = vadd.f32 %v4799_v31, %v2807_v2  ;;  %v2787_v25 = vadd.f32 %v2736_v62, %v2641_v48  ;;  %v2812_v5 = vmul.f32 %v4779_v38, %v2789_v61  ;;  %v5085_v55 = vld [vmem:[#allocation36_spill] sm:$0xff] }
 0x41e   : > { %v3765_v6 = vpop.f32.mrf.mxu0  ;;  %v2240_v2 = vadd.f32 %v5083_v32, %v2092_v41  ;;  %v2648_v61 = vadd.f32 %v3751_v11, %v2502_v44  ;;  %v2505_v19 = vadd.f32 %v4748_v8, %v2242_v33  ;;  %v2241_v62 = vadd.f32 %v5085_v55, %v2093_v22 }
 0x41f   : > { %v2862_v59 = vpack.c.bf16 %v2848_v29, %v2847_v27  ;;  %v2846_v0 = vmax.f32 %v2830_v26, 0.0  ;;  %v2810_v9 = vmul.f32 %v4779_v38, %v2787_v25  ;;  %v2790_v56 = vadd.f32 %v3765_v6, %v2644_v49 }
 0x420   : > { %v2739_v63 = vpop.f32.mrf.mxu0  ;;  %v2835_v48 = vadd.f32 %v4799_v31, %v2812_v5  ;;  %v2503_v29 = vadd.f32 %v4754_v52, %v2240_v2  ;;  %v2506_v8 = vadd.f32 %v4760_v14, %v2243_v35  ;;  %v2504_v42 = vadd.f32 %v4767_v43, %v2241_v62  ;;  %v5086_v62 = vld [vmem:[#allocation8_spill] sm:$0xff] }
 0x421   : > { %v2861_v47 = vpack.c.bf16 %v2846_v0, %v2845_v40  ;;  %v2788_v30 = vadd.f32 %v2739_v63, %v2642_v28  ;;  %v2813_v39 = vmul.f32 %v4779_v38, %v2790_v56  ;;  %v2833_v18 = vadd.f32 %v4799_v31, %v2810_v9 }
 0x422   : > { %v3768_v23 = vpop.f32.mrf.mxu0  ;;  %v2851_v27 = vmax.f32 %v2835_v48, 0.0  ;;  %v2646_v28 = vadd.f32 %v2609_v58, %v2500_v37  ;;  %v2651_v40 = vadd.f32 %v3754_v24, %v2505_v19  ;;  %v2649_v52 = vadd.f32 %v2622_v21, %v2503_v29 }
 0x423   : > { %v2811_v20 = vmul.f32 %v4779_v38, %v2788_v30  ;;  %v2793_v16 = vadd.f32 %v3768_v23, %v2647_v12  ;;  %3776 = vmatprep.mubr.msk.bf16.mxu1 %vm1291_vm10, %v2861_v47  ;;  %v2836_v36 = vadd.f32 %v4799_v31, %v2813_v39  ;;  %v2849_v26 = vmax.f32 %v2833_v18, 0.0 }
 0x424   : > { %v2752_v54 = vpop.f32.mrf.mxu0  ;;  %3777 = vmatmul.mubr.msk.bf16.vlgmr.msra.gmra.mxu1 %vm1291_vm10, %v2862_v59  ;;  %v2652_v14 = vadd.f32 %v3755_v53, %v2506_v8  ;;  %v2650_v47 = vadd.f32 %v2625_v45, %v2504_v42 }
 0x425   : > { %v2834_v4 = vadd.f32 %v4799_v31, %v2811_v20  ;;  %v2816_v50 = vmul.f32 %v4779_v38, %v2793_v16  ;;  %v2791_v46 = vadd.f32 %v2752_v54, %v2645_v3  ;;  %v2852_v13 = vmax.f32 %v2836_v36, 0.0 }
 0x426   : > { %v3769_v11 = vpop.f32.mrf.mxu0 }
 0x427   : > { %v2850_v25 = vmax.f32 %v2834_v4, 0.0  ;;  %v2794_v49 = vadd.f32 %v3769_v11, %v2648_v61  ;;  %v2864_v15 = vpack.c.bf16 %v2852_v13, %v2851_v27  ;;  %v2814_v5 = vmul.f32 %v4779_v38, %v2791_v46 }
 0x428   : > { %v2755_v6 = vpop.f32.mrf.mxu0  ;;  %v2839_v0 = vadd.f32 %v4799_v31, %v2816_v50 }
 0x429   : > { %v2863_v59 = vpack.c.bf16 %v2850_v25, %v2849_v26  ;;  %v2817_v9 = vmul.f32 %v4779_v38, %v2794_v49  ;;  %v2792_v1 = vadd.f32 %v2755_v6, %v2646_v28  ;;  %v2837_v44 = vadd.f32 %v4799_v31, %v2814_v5  ;;  %v5087_v25 = vld [vmem:[#allocation4_spill] sm:$0xff]  ;;  %v5088_v5 = vld [vmem:[#allocation9_spill] sm:$0xff] }
 0x42a   : > { %v3772_v57 = vpop.f32.mrf.mxu0  ;;  %v2855_v63 = vmax.f32 %v2839_v0, 0.0 }
 0x42b   : > { %v2840_v58 = vadd.f32 %v4799_v31, %v2817_v9  ;;  %v2797_v41 = vadd.f32 %v3772_v57, %v2651_v40  ;;  %3780 = vmatprep.mubr.msk.bf16.mxu1 %vm1291_vm10, %v2863_v59  ;;  %v2815_v24 = vmul.f32 %v4779_v38, %v2792_v1  ;;  %v2853_v51 = vmax.f32 %v2837_v44, 0.0  ;;  %v5089_v1 = vld [vmem:[#allocation5_spill] sm:$0xff] }
 0x42c   : > { %v2768_v56 = vpop.f32.mrf.mxu0  ;;  %3781 = vmatmul.mubr.msk.bf16.gmra.mxu1 %vm1291_vm10, %v2864_v15 }
 0x42d   : > { %v2856_v34 = vmax.f32 %v2840_v58, 0.0  ;;  %v2820_v17 = vmul.f32 %v4779_v38, %v2797_v41  ;;  %v2795_v33 = vadd.f32 %v2768_v56, %v2649_v52  ;;  %v2838_v43 = vadd.f32 %v4799_v31, %v2815_v24 }
 0x42e   : > { %v3773_v12 = vpop.f32.mrf.mxu0 }
 0x42f   : > { %v2866_v30 = vpack.c.bf16 %v2856_v34, %v2855_v63  ;;  %v2818_v10 = vmul.f32 %v4779_v38, %v2795_v33  ;;  %v2798_v60 = vadd.f32 %v3773_v12, %v2652_v14  ;;  %v2854_v22 = vmax.f32 %v2838_v43, 0.0  ;;  %v5090_v14 = vld [vmem:[#allocation16_spill] sm:$0xff] }
 0x430   : > { %v2771_v48 = vpop.f32.mrf.mxu0  ;;  %v2843_v39 = vadd.f32 %v4799_v31, %v2820_v17  ;;  %v5091_v34 = vld [vmem:[#allocation12_spill] sm:$0xff] }
 0x431   : > { %v2821_v23 = vmul.f32 %v4779_v38, %v2798_v60  ;;  %v2796_v3 = vadd.f32 %v2771_v48, %v2650_v47  ;;  %v2865_v18 = vpack.c.bf16 %v2854_v22, %v2853_v51  ;;  %v2841_v20 = vadd.f32 %v4799_v31, %v2818_v10  ;;  %v5092_v47 = vld [vmem:[#allocation17_spill] sm:$0xff] }
 0x432   : > { %v2859_v2 = vmax.f32 %v2843_v39, 0.0  ;;  %v5093_v48 = vld [vmem:[#allocation13_spill] sm:$0xff] }
 0x433   : > { %v2844_v16 = vadd.f32 %v4799_v31, %v2821_v23  ;;  %v2819_v32 = vmul.f32 %v4779_v38, %v2796_v3  ;;  %3784 = vmatprep.mubr.msk.bf16.mxu1 %vm1291_vm10, %v2865_v18  ;;  %v2857_v21 = vmax.f32 %v2841_v20, 0.0  ;;  %v4880_v38 = vld [vmem:[%s4992_s10] ss:$0 sm:$0xff] }
 0x434   : > { %3785 = vmatmul.mubr.msk.bf16.gmra.mxu1 %vm1291_vm10, %v2866_v30 }
 0x435   : > { %v2860_v37 = vmax.f32 %v2844_v16, 0.0  ;;  %v2842_v61 = vadd.f32 %v4799_v31, %v2819_v32  ;;  %v4885_v31 = vld [vmem:[%s4993_s11] ss:$0 sm:$0xff] }
 0x436   : > { %v5094_v32 = vld [vmem:[#allocation10_spill] sm:$0xff] }
 0x437   : > { %v2868_v36 = vpack.c.bf16 %v2860_v37, %v2859_v2  ;;  %v2858_v54 = vmax.f32 %v2842_v61, 0.0 }
 0x439   : > { %v2867_v19 = vpack.c.bf16 %v2858_v54, %v2857_v21  ;;  %v5095_v54 = vld [vmem:[#allocation6_spill] sm:$0xff] }
 0x43b   : > { %3788 = vmatprep.mubr.msk.bf16.mxu1 %vm1291_vm10, %v2867_v19 }
 0x43c   : > { %3789 = vmatmul.mubr.msk.bf16.gmra.mxu1 %vm1291_vm10, %v2868_v36 }
 0x4e4   : > { %v3778_v4 = vpop.f32.mrf.mxu1 }
 0x4e5   : > { %v3003_v50 = vmul.f32 %v3778_v4, %v4880_v38 }
 0x4e6   : > { %v2931_v46 = vpop.f32.mrf.mxu1 }
 0x4e7   : > { %v3026_v7 = vadd.f32 %v4885_v31, %v3003_v50  ;;  %v3001_v35 = vmul.f32 %v4880_v38, %v2931_v46 }
 0x4e8   : > { %v3779_v55 = vpop.f32.mrf.mxu1 }
 0x4e9   : > { %v3042_v27 = vadd.f32 %v3026_v7, %v5086_v62  ;;  %v3024_v13 = vadd.f32 %v4885_v31, %v3001_v35  ;;  %v3004_v11 = vmul.f32 %v3779_v55, %v4880_v38  ;;  %v5096_v35 = vld [vmem:[#allocation11_spill] sm:$0xff] }
 0x4ea   : > { %v2934_v29 = vpop.f32.mrf.mxu1 }
 0x4eb   : > { %v3058_v26 = vmax.f32 %v3042_v27, 0.0  ;;  %v3040_v49 = vadd.f32 %v3024_v13, %v5087_v25  ;;  %v3027_v28 = vadd.f32 %v4885_v31, %v3004_v11  ;;  %v3002_v8 = vmul.f32 %v4880_v38, %v2934_v29  ;;  %v5097_v29 = vld [vmem:[#allocation7_spill] sm:$0xff] }
 0x4ec   : > { %v3782_v53 = vpop.f32.mrf.mxu1 }
 0x4ed   : > { %3074 = vst.msk [vmem:[%s4031_s22 + $0x10] sm:$0xff] %vm620_vm1, %v3058_v26  ;;  %v3056_v15 = vmax.f32 %v3040_v49, 0.0  ;;  %v3043_v6 = vadd.f32 %v3027_v28, %v5088_v5  ;;  %v3025_v40 = vadd.f32 %v4885_v31, %v3002_v8  ;;  %v3007_v59 = vmul.f32 %v3782_v53, %v4880_v38  ;;  %v5098_v53 = vld [vmem:[#allocation18_spill] sm:$0xff] }
 0x4ee   : > { %v2947_v0 = vpop.f32.mrf.mxu1 }
 0x4ef   : > { %3072 = vst.msk [vmem:[%s4031_s22] sm:$0xff] %vm620_vm1, %v3056_v15  ;;  %v3059_v9 = vmax.f32 %v3043_v6, 0.0  ;;  %v3041_v57 = vadd.f32 %v3025_v40, %v5089_v1  ;;  %v3030_v52 = vadd.f32 %v4885_v31, %v3007_v59  ;;  %v3005_v42 = vmul.f32 %v4880_v38, %v2947_v0  ;;  %v5099_v0 = vld [vmem:[#allocation14_spill] sm:$0xff] }
 0x4f0   : > { %v3783_v58 = vpop.f32.mrf.mxu1 }
 0x4f1   : > { %3075 = vst.msk [vmem:[%s4031_s22 + $0x18] sm:$0xff] %vm620_vm1, %v3059_v9  ;;  %v3057_v41 = vmax.f32 %v3041_v57, 0.0  ;;  %v3046_v45 = vadd.f32 %v3030_v52, %v5090_v14  ;;  %v3028_v44 = vadd.f32 %v4885_v31, %v3005_v42  ;;  %v3008_v24 = vmul.f32 %v3783_v58, %v4880_v38  ;;  %v5100_v42 = vld [vmem:[#allocation19_spill] sm:$0xff] }
 0x4f2   : > { %v2950_v56 = vpop.f32.mrf.mxu1 }
 0x4f3   : > { %3073 = vst.msk [vmem:[%s4031_s22 + $0x8] sm:$0xff] %vm620_vm1, %v3057_v41  ;;  %v3062_v63 = vmax.f32 %v3046_v45, 0.0  ;;  %v3044_v17 = vadd.f32 %v3028_v44, %v5091_v34  ;;  %v3031_v33 = vadd.f32 %v4885_v31, %v3008_v24  ;;  %v3006_v43 = vmul.f32 %v4880_v38, %v2950_v56  ;;  %v5101_v45 = vld [vmem:[#allocation15_spill] sm:$0xff] }
 0x4f4   : > { %v3786_v60 = vpop.f32.mrf.mxu1 }
 0x4f5   : > { %3078 = vst.msk [vmem:[%s4031_s22 + $0x30] sm:$0xff] %vm620_vm1, %v3062_v63  ;;  %v3060_v12 = vmax.f32 %v3044_v17, 0.0  ;;  %v3047_v30 = vadd.f32 %v3031_v33, %v5092_v47  ;;  %v3029_v10 = vadd.f32 %v4885_v31, %v3006_v43  ;;  %v3011_v51 = vmul.f32 %v3786_v60, %v4880_v38 }
 0x4f6   : > { %v2963_v23 = vpop.f32.mrf.mxu1 }
 0x4f7   : > { %3076 = vst.msk [vmem:[%s4031_s22 + $0x20] sm:$0xff] %vm620_vm1, %v3060_v12  ;;  %v3063_v22 = vmax.f32 %v3047_v30, 0.0  ;;  %v3045_v39 = vadd.f32 %v3029_v10, %v5093_v48  ;;  %v3034_v3 = vadd.f32 %v4885_v31, %v3011_v51  ;;  %v3009_v18 = vmul.f32 %v4880_v38, %v2963_v23 }
 0x4f8   : > { %v3787_v16 = vpop.f32.mrf.mxu1 }
 0x4f9   : > { %3079 = vst.msk [vmem:[%s4031_s22 + $0x38] sm:$0xff] %vm620_vm1, %v3063_v22  ;;  %v3061_v20 = vmax.f32 %v3045_v39, 0.0  ;;  %v3050_v2 = vadd.f32 %v3034_v3, %v5094_v32  ;;  %v3032_v37 = vadd.f32 %v4885_v31, %v3009_v18  ;;  %v3012_v61 = vmul.f32 %v3787_v16, %v4880_v38 }
 0x4fa   : > { %v2966_v21 = vpop.f32.mrf.mxu1 }
 0x4fb   : > { %3077 = vst.msk [vmem:[%s4031_s22 + $0x28] sm:$0xff] %vm620_vm1, %v3061_v20  ;;  %v3066_v36 = vmax.f32 %v3050_v2, 0.0  ;;  %v3048_v19 = vadd.f32 %v3032_v37, %v5095_v54  ;;  %v3035_v4 = vadd.f32 %v4885_v31, %v3012_v61  ;;  %v3010_v50 = vmul.f32 %v4880_v38, %v2966_v21 }
 0x4fc   : > { %v3790_v46 = vpop.f32.mrf.mxu1 }
 0x4fd   : > { %3082 = vst.msk [vmem:[%s4031_s22 + $0x50] sm:$0xff] %vm620_vm1, %v3066_v36  ;;  %v3064_v7 = vmax.f32 %v3048_v19, 0.0  ;;  %v3051_v55 = vadd.f32 %v3035_v4, %v5096_v35  ;;  %v3033_v62 = vadd.f32 %v4885_v31, %v3010_v50  ;;  %v3015_v27 = vmul.f32 %v3790_v46, %v4880_v38 }
 0x4fe   : > { %v2979_v13 = vpop.f32.mrf.mxu1 }
 0x4ff   : > { %3080 = vst.msk [vmem:[%s4031_s22 + $0x40] sm:$0xff] %vm620_vm1, %v3064_v7  ;;  %v3067_v11 = vmax.f32 %v3051_v55, 0.0  ;;  %v3049_v26 = vadd.f32 %v3033_v62, %v5097_v29  ;;  %v3038_v25 = vadd.f32 %v4885_v31, %v3015_v27  ;;  %v3013_v49 = vmul.f32 %v4880_v38, %v2979_v13 }
 0x500   : > { %v3791_v28 = vpop.f32.mrf.mxu1 }
 0x501   : > { %3083 = vst.msk [vmem:[%s4031_s22 + $0x58] sm:$0xff] %vm620_vm1, %v3067_v11  ;;  %v3065_v8 = vmax.f32 %v3049_v26, 0.0  ;;  %v3054_v15 = vadd.f32 %v3038_v25, %v5098_v53  ;;  %v3036_v5 = vadd.f32 %v4885_v31, %v3013_v49  ;;  %v3016_v6 = vmul.f32 %v3791_v28, %v4880_v38 }
 0x502   : > { %v2982_v40 = vpop.f32.mrf.mxu1 }
 0x503   : > { %3081 = vst.msk [vmem:[%s4031_s22 + $0x48] sm:$0xff] %vm620_vm1, %v3065_v8  ;;  %v3070_v59 = vmax.f32 %v3054_v15, 0.0  ;;  %v3052_v9 = vadd.f32 %v3036_v5, %v5099_v0  ;;  %v3039_v1 = vadd.f32 %v4885_v31, %v3016_v6  ;;  %v3014_v57 = vmul.f32 %v4880_v38, %v2982_v40 }
 0x505   : > { %3086 = vst.msk [vmem:[%s4031_s22 + $0x70] sm:$0xff] %vm620_vm1, %v3070_v59  ;;  %v3068_v52 = vmax.f32 %v3052_v9, 0.0  ;;  %v3055_v58 = vadd.f32 %v3039_v1, %v5100_v42  ;;  %v3037_v41 = vadd.f32 %v4885_v31, %v3014_v57 }
 0x507   : > { %3084 = vst.msk [vmem:[%s4031_s22 + $0x60] sm:$0xff] %vm620_vm1, %v3068_v52  ;;  %v3071_v14 = vmax.f32 %v3055_v58, 0.0  ;;  %v3053_v44 = vadd.f32 %v3037_v41, %v5101_v45 }
 0x509   : > { %3087 = vst.msk [vmem:[%s4031_s22 + $0x78] sm:$0xff] %vm620_vm1, %v3071_v14  ;;  %v3069_v24 = vmax.f32 %v3053_v44, 0.0 }
 0x50b   : > { %3085 = vst.msk [vmem:[%s4031_s22 + $0x68] sm:$0xff] %vm620_vm1, %v3069_v24 }
 0x50c PF: > { %s22_s25 = sadd.s32 1, %s3901_s25   ;;  %s5102_s27 = sld [smem:[#allocation3_spill]] }
 0x50d   : > { %p19_p1 = scmp.ge.s32.totalorder %s22_s25, 6   ;;  %s5103_s21 = smov %s3893_s23 }
 0x50e   : > { %s5104_s22 = smov %s3897_s24  ;;  %s5105_s23 = smov %s5108_s26 }
 0x50f   :  { %21 = sbr.rel (!%p19_p1) target bundleno = 4 (0x4), region = 123 }
 0x512   : > { %s5106_s24 = smov %s5102_s27 }

</bundles_post_ra>
